<compile_context>
chip_gen: v7x
topology: tpu7x:2x2x1
jax: 0.10.0
libtpu: 0.0.40
codegen_flags: <defaults>
</compile_context>

<pallas_src>
import math
import numpy as np
import jax
import jax.numpy as jnp
from jax import lax
from jax.experimental import pallas as pl
from jax.experimental.pallas import tpu as pltpu

# ----------------------------- config (synthetic) -----------------------------
N_IMG = 2                 # batch of images
C = 8                     # feature channels
H = W = 16                # feature-map spatial size
STRIDE = 4                # feature stride -> pooler scale = 1/4
IMG_H, IMG_W = H * STRIDE, W * STRIDE
P = 8                     # ROI_BOX_HEAD.POOLER_RESOLUTION
N_PER_IMG = 8             # proposals per image
R = N_IMG * N_PER_IMG     # total rois
FC_DIM = 64               # box head FC dim (small synthetic)
NUM_CLASSES = 15          # foreground classes -> cls logits have NUM_CLASSES+1
COSINE_SCALE = 20.0       # CosineSimOutputLayers scale
BBOX_REG_W = (10.0, 10.0, 5.0, 5.0)   # Box2BoxTransform weights
SCALE_CLAMP = math.log(1000.0 / 16.0)


# ------------------------------ fused Pallas kernel ----------------------------
def fused_roi_heads_kernel(
    wy_ref,        # (R*P, N*H)    y-interp weights, image gather folded in
    feat_ref,      # (N*H, C*W)    feature maps, rows (n,h), cols (c,w)
    wxbd_ref,      # (R, C*W, C*P) per-roi x-interp, block-diagonal over channels
    boxes_ref,     # (R, 4)        proposal boxes (xyxy)
    w1_ref,        # (P, C*P, FC)  fc1 weights, rows permuted to (p, c, q)
    b1_ref,        # (1, FC)
    w2_ref,        # (FC, FC)
    b2_ref,        # (1, FC)
    wc_ref,        # (FC, NUM_CLASSES+1)
    wb_ref,        # (FC, 4)
    bb_ref,        # (1, 4)
    gmat_ref,      # (4, 8)  boxes  -> [w, h, w, h, cx, cy, cx, cy]
    dmat_ref,      # (4, 8)  deltas -> [dx, dy, dx, dy, dw, dh, dw, dh] / weights
    probs_ref,     # OUT (R, NUM_CLASSES+1)
    boxes_out_ref, # OUT (R, 4)
    pooled_ref,    # SCRATCH (R*P, C*P)  pooled[r, c, p, q] at [r*P+p, c*P+q]
):
    # ---- ROIAlign, step 1: y-interpolation + image gather, one big matmul ----
    # tmp[(r,p), (c,w)] = sum_h Wy[r,p,h] * feat[batch_idx[r], c, h, w]
    tmp = jnp.dot(wy_ref[...], feat_ref[...],
                  preferred_element_type=jnp.float32)          # (R*P, C*W) = (128, 128)

    # ---- ROIAlign, step 2: per-roi x-interpolation (block-diag over channels) ----
    # pooled[(r,p), (c,q)] = sum_w tmp[(r,p),(c,w)] * Wx[r,q,w]
    for r in range(R):                                         # static unroll (16)
        pooled_ref[r * P:(r + 1) * P, :] = jnp.dot(
            tmp[r * P:(r + 1) * P, :], wxbd_ref[r],
            preferred_element_type=jnp.float32)                # (P, C*P)

    # ---- box head: relu(fc2(relu(fc1(flatten(pooled))))) ----
    # fc1 contracts (c, p, q); the p axis is handled with stride-P sublane reads.
    h = jnp.zeros((R, FC_DIM), jnp.float32)
    for p in range(P):                                         # static unroll (8)
        xp = pooled_ref[pl.ds(p, R, stride=P), :]              # (R, C*P) rows = rois
        h = h + jnp.dot(xp, w1_ref[p], preferred_element_type=jnp.float32)
    h = jnp.maximum(h + b1_ref[...], 0.0)
    h = jnp.dot(h, w2_ref[...], preferred_element_type=jnp.float32) + b2_ref[...]
    x = jnp.maximum(h, 0.0)                                    # (R, FC_DIM)

    # ---- CosineSimOutputLayers: scaled cosine-similarity classification ----
    # (rsqrt ~= divide-by-(norm + 1e-5) of the reference to ~1e-5 relative;
    #  exactness does not matter here, EUP rsqrt is effectively free)
    x_n = x * lax.rsqrt(jnp.sum(x * x, axis=1, keepdims=True) + 1e-10)
    wc = wc_ref[...]
    wc_n = wc * lax.rsqrt(jnp.sum(wc * wc, axis=0, keepdims=True) + 1e-10)
    scores = COSINE_SCALE * jnp.dot(x_n, wc_n, preferred_element_type=jnp.float32)

    # softmax (FastRCNNOutputs.inference) -- exact normalization: the hardware
    # approximate reciprocal violates the 1e-3 row-sum tolerance.
    m = jnp.max(scores, axis=1, keepdims=True)
    e = jnp.exp(scores - m)
    probs_ref[...] = e / jnp.sum(e, axis=1, keepdims=True)

    # ---- class-agnostic bbox regression + Box2BoxTransform.apply_deltas + clip ----
    deltas = jnp.dot(x, wb_ref[...], preferred_element_type=jnp.float32) + bb_ref[...]
    g8 = jnp.dot(boxes_ref[...], gmat_ref[...],
                 preferred_element_type=jnp.float32)           # [w,h,w,h,cx,cy,cx,cy]
    d8 = jnp.dot(deltas, dmat_ref[...],
                 preferred_element_type=jnp.float32)           # weighted duplicated deltas
    wh = g8[:, 0:4]                                            # [w, h, w, h]
    ctr = g8[:, 4:8]                                           # [cx, cy, cx, cy]
    dxy = d8[:, 0:4]                                           # [dx, dy, dx, dy]
    dwh = jnp.minimum(d8[:, 4:8], SCALE_CLAMP)                 # clamp(max=SCALE_CLAMP)

    col = lax.broadcasted_iota(jnp.int32, (R, 4), 1)
    sign = jnp.where(col < 2, -0.5, 0.5)                       # x1,y1: -0.5 ; x2,y2: +0.5
    lim = jnp.where((col & 1) == 0, float(IMG_W), float(IMG_H))
    pred = ctr + dxy * wh + sign * jnp.exp(dwh) * wh
    boxes_out_ref[...] = jnp.clip(pred, 0.0, lim)


# ------------------------------- JAX glue --------------------------------------
def _interp_matrix(start, bin_size, size):
    """Bilinear-interp weights for ROIAlign (sampling_ratio=1, aligned=True).

    start, bin_size: (R,) in feature coords.  Returns (R, P, size)."""
    c = start[:, None] + (jnp.arange(P, dtype=jnp.float32) + 0.5) * bin_size[:, None]
    valid = ((c >= -1.0) & (c <= float(size))).astype(jnp.float32)
    cc = jnp.clip(c, 0.0, float(size) - 1.0)
    grid = jnp.arange(size, dtype=jnp.float32)
    w = jnp.maximum(0.0, 1.0 - jnp.abs(cc[:, :, None] - grid[None, None, :]))
    return w * valid[:, :, None]


def _decode_mats():
    """Constant matrices for whole-tile box decoding."""
    g = np.zeros((4, 8), np.float32)
    # columns 0..3: [w, h, w, h] ; columns 4..7: [cx, cy, cx, cy]
    g[0, 0] = g[0, 2] = -1.0; g[2, 0] = g[2, 2] = 1.0
    g[1, 1] = g[1, 3] = -1.0; g[3, 1] = g[3, 3] = 1.0
    g[0, 4] = g[0, 6] = 0.5;  g[2, 4] = g[2, 6] = 0.5
    g[1, 5] = g[1, 7] = 0.5;  g[3, 5] = g[3, 7] = 0.5
    d = np.zeros((4, 8), np.float32)
    # columns 0..3: [dx, dy, dx, dy]/wxy ; columns 4..7: [dw, dh, dw, dh]/wwh
    d[0, 0] = d[0, 2] = 1.0 / BBOX_REG_W[0]
    d[1, 1] = d[1, 3] = 1.0 / BBOX_REG_W[1]
    d[2, 4] = d[2, 6] = 1.0 / BBOX_REG_W[2]
    d[3, 5] = d[3, 7] = 1.0 / BBOX_REG_W[3]
    return jnp.asarray(g), jnp.asarray(d)


def standard_roi_heads_forward(features, boxes, batch_idx, params):
    """features: (N, C, H, W) NCHW; boxes: (R, 4) xyxy; batch_idx: (R,) int32."""
    scale = 1.0 / STRIDE
    x1, y1, x2, y2 = boxes[:, 0], boxes[:, 1], boxes[:, 2], boxes[:, 3]
    sx = x1 * scale - 0.5                     # aligned=True
    sy = y1 * scale - 0.5
    bw = (x2 - x1) * scale / P
    bh = (y2 - y1) * scale / P
    wy = _interp_matrix(sy, bh, H)            # (R, P, H)
    wx = _interp_matrix(sx, bw, W)            # (R, P, W)

    # y-interp operator with the per-roi image gather baked in (no (R,C,H,W) copy).
    onehot = (batch_idx[:, None] == jnp.arange(N_IMG)[None, :]).astype(jnp.float32)
    wy_big = jnp.einsum("rn,rph->rpnh", onehot, wy).reshape(R * P, N_IMG * H)

    # per-roi x-interp operator, block-diagonal over channels.
    wxt = jnp.transpose(wx, (0, 2, 1))        # (R, W, P): [r, w, q] = Wx[r, q, w]
    eye_c = jnp.eye(C, dtype=jnp.float32)
    wxbd = jnp.einsum("cd,rwq->rcwdq", eye_c, wxt).reshape(R, C * W, C * P)

    # features as (N*H, C*W): rows (n, h), cols (c, w).
    feat2 = jnp.transpose(features, (0, 2, 1, 3)).reshape(N_IMG * H, C * W)

    # fc1 weight: canonical rows are flatten(C, P, P); permute to (p, c*P+q, f)
    # so the kernel can contract p via stride-P reads of the pooled scratch.
    w1p = jnp.transpose(params["w1"].reshape(C, P, P, FC_DIM),
                        (1, 0, 2, 3)).reshape(P, C * P, FC_DIM)

    gmat, dmat = _decode_mats()

    vmem = pl.BlockSpec(memory_space=pltpu.MemorySpace.VMEM)
    probs, pred_boxes = pl.pallas_call(
        fused_roi_heads_kernel,
        out_shape=(
            jax.ShapeDtypeStruct((R, NUM_CLASSES + 1), jnp.float32),
            jax.ShapeDtypeStruct((R, 4), jnp.float32),
        ),
        in_specs=[vmem] * 13,
        out_specs=(vmem, vmem),
        scratch_shapes=[pltpu.VMEM((R * P, C * P), jnp.float32)],
    )(wy_big, feat2, wxbd, boxes, w1p,
      params["b1"], params["w2"], params["b2"],
      params["wc"], params["wb"], params["bb"], gmat, dmat)
    # TODO(synk): per-image score thresholding + NMS + top-k (variable-size output).
    return probs, pred_boxes


# --------------------------------- main ----------------------------------------
if __name__ == "__main__":
    key = jax.random.PRNGKey(0)
    k_feat, k_box, k_w1, k_w2, k_wc, k_wb = jax.random.split(key, 6)

    # input feature map (single FPN level), NCHW
    features = jax.random.normal(k_feat, (N_IMG, C, H, W), dtype=jnp.float32)

    # deterministic proposal boxes (xyxy, image coords)
    kb1, kb2 = jax.random.split(k_box)
    xy1 = jax.random.uniform(kb1, (R, 2), minval=0.0, maxval=IMG_W * 0.6)
    wh = jax.random.uniform(kb2, (R, 2), minval=8.0, maxval=24.0)
    boxes = jnp.concatenate(
        [xy1, jnp.minimum(xy1 + wh, float(IMG_W) - 1.0)], axis=1).astype(jnp.float32)
    batch_idx = jnp.repeat(jnp.arange(N_IMG, dtype=jnp.int32), N_PER_IMG)

    # deterministic synthetic parameters ((in, out) layout; transpose a real
    # PyTorch nn.Linear (out, in) weight when porting).
    d_in = C * P * P
    params = {
        "w1": 0.02 * jax.random.normal(k_w1, (d_in, FC_DIM), dtype=jnp.float32),
        "b1": jnp.zeros((1, FC_DIM), jnp.float32),
        "w2": 0.02 * jax.random.normal(k_w2, (FC_DIM, FC_DIM), dtype=jnp.float32),
        "b2": jnp.zeros((1, FC_DIM), jnp.float32),
        "wc": 0.02 * jax.random.normal(k_wc, (FC_DIM, NUM_CLASSES + 1), dtype=jnp.float32),
        "wb": 0.01 * jax.random.normal(k_wb, (FC_DIM, 4), dtype=jnp.float32),
        "bb": jnp.zeros((1, 4), jnp.float32),
    }

    probs, pred_boxes = jax.jit(standard_roi_heads_forward)(
        features, boxes, batch_idx, params)
    jax.block_until_ready((probs, pred_boxes))

    assert probs.shape == (R, NUM_CLASSES + 1)
    assert pred_boxes.shape == (R, 4)
    assert bool(jnp.all(jnp.isfinite(probs))) and bool(jnp.all(jnp.isfinite(pred_boxes)))
    # softmax rows should sum to ~1
    assert bool(jnp.all(jnp.abs(jnp.sum(probs, axis=1) - 1.0) < 1e-3))
    print("KERNEL_OK")
</pallas_src>

<mosaic_0001>
module attributes {stable_mosaic.version = 11 : i64} {
  func.func @fused_roi_heads_kernel(%arg0: memref<128x32xf32, #tpu.memory_space<vmem>>, %arg1: memref<32x128xf32, #tpu.memory_space<vmem>>, %arg2: memref<16x128x64xf32, #tpu.memory_space<vmem>>, %arg3: memref<16x4xf32, #tpu.memory_space<vmem>>, %arg4: memref<8x64x64xf32, #tpu.memory_space<vmem>>, %arg5: memref<1x64xf32, #tpu.memory_space<vmem>>, %arg6: memref<64x64xf32, #tpu.memory_space<vmem>>, %arg7: memref<1x64xf32, #tpu.memory_space<vmem>>, %arg8: memref<64x16xf32, #tpu.memory_space<vmem>>, %arg9: memref<64x4xf32, #tpu.memory_space<vmem>>, %arg10: memref<1x4xf32, #tpu.memory_space<vmem>>, %arg11: memref<4x8xf32, #tpu.memory_space<vmem>>, %arg12: memref<4x8xf32, #tpu.memory_space<vmem>>, %arg13: memref<16x16xf32, #tpu.memory_space<vmem>>, %arg14: memref<16x4xf32, #tpu.memory_space<vmem>>, %arg15: memref<128x64xf32, #tpu.memory_space<vmem>>) attributes {dimension_semantics = [], scalar_prefetch = 0 : i64, scratch_operands = 1 : i64, tpu.core_type = #tpu.core_type<tc>} {
    %c0 = arith.constant 0 : index
    %c0_0 = arith.constant 0 : index
    %0 = vector.load %arg0[%c0, %c0_0] : memref<128x32xf32, #tpu.memory_space<vmem>>, vector<128x32xf32>
    %c0_1 = arith.constant 0 : index
    %c0_2 = arith.constant 0 : index
    %1 = vector.load %arg1[%c0_1, %c0_2] : memref<32x128xf32, #tpu.memory_space<vmem>>, vector<32x128xf32>
    %cst = arith.constant dense<0.000000e+00> : vector<128x128xf32>
    %2 = tpu.matmul %0, %1, %cst {dimension_numbers = #tpu.dot_dimension_numbers<[1], [0], [0], [1], [0, 0, 1, 1], [], []>} : vector<128x32xf32>, vector<32x128xf32>, vector<128x128xf32> -> vector<128x128xf32>
    %3 = vector.extract_strided_slice %2 {offsets = [0, 0], sizes = [8, 128], strides = [1, 1]} : vector<128x128xf32> to vector<8x128xf32>
    %c0_3 = arith.constant 0 : index
    %c0_4 = arith.constant 0 : index
    %c0_5 = arith.constant 0 : index
    %4 = vector.load %arg2[%c0_3, %c0_4, %c0_5] : memref<16x128x64xf32, #tpu.memory_space<vmem>>, vector<1x128x64xf32>
    %5 = vector.shape_cast %4 : vector<1x128x64xf32> to vector<128x64xf32>
    %cst_6 = arith.constant dense<0.000000e+00> : vector<8x64xf32>
    %6 = tpu.matmul %3, %5, %cst_6 {dimension_numbers = #tpu.dot_dimension_numbers<[1], [0], [0], [1], [0, 0, 1, 1], [], []>} : vector<8x128xf32>, vector<128x64xf32>, vector<8x64xf32> -> vector<8x64xf32>
    %c0_7 = arith.constant 0 : index
    %c0_8 = arith.constant 0 : index
    %7 = vector.load %arg15[%c0_7, %c0_8] : memref<128x64xf32, #tpu.memory_space<vmem>>, vector<8x64xf32>
    tpu.vector_store %arg15[%c0_7, %c0_8], %6 {strides = array<i32>} : memref<128x64xf32, #tpu.memory_space<vmem>>, vector<8x64xf32>,
    %8 = vector.extract_strided_slice %2 {offsets = [8, 0], sizes = [8, 128], strides = [1, 1]} : vector<128x128xf32> to vector<8x128xf32>
    %c1 = arith.constant 1 : index
    %c0_9 = arith.constant 0 : index
    %c0_10 = arith.constant 0 : index
    %9 = vector.load %arg2[%c1, %c0_9, %c0_10] : memref<16x128x64xf32, #tpu.memory_space<vmem>>, vector<1x128x64xf32>
    %10 = vector.shape_cast %9 : vector<1x128x64xf32> to vector<128x64xf32>
    %cst_11 = arith.constant dense<0.000000e+00> : vector<8x64xf32>
    %11 = tpu.matmul %8, %10, %cst_11 {dimension_numbers = #tpu.dot_dimension_numbers<[1], [0], [0], [1], [0, 0, 1, 1], [], []>} : vector<8x128xf32>, vector<128x64xf32>, vector<8x64xf32> -> vector<8x64xf32>
    %c8 = arith.constant 8 : index
    %c0_12 = arith.constant 0 : index
    %12 = vector.load %arg15[%c8, %c0_12] : memref<128x64xf32, #tpu.memory_space<vmem>>, vector<8x64xf32>
    tpu.vector_store %arg15[%c8, %c0_12], %11 {strides = array<i32>} : memref<128x64xf32, #tpu.memory_space<vmem>>, vector<8x64xf32>,
    %13 = vector.extract_strided_slice %2 {offsets = [16, 0], sizes = [8, 128], strides = [1, 1]} : vector<128x128xf32> to vector<8x128xf32>
    %c2 = arith.constant 2 : index
    %c0_13 = arith.constant 0 : index
    %c0_14 = arith.constant 0 : index
    %14 = vector.load %arg2[%c2, %c0_13, %c0_14] : memref<16x128x64xf32, #tpu.memory_space<vmem>>, vector<1x128x64xf32>
    %15 = vector.shape_cast %14 : vector<1x128x64xf32> to vector<128x64xf32>
    %cst_15 = arith.constant dense<0.000000e+00> : vector<8x64xf32>
    %16 = tpu.matmul %13, %15, %cst_15 {dimension_numbers = #tpu.dot_dimension_numbers<[1], [0], [0], [1], [0, 0, 1, 1], [], []>} : vector<8x128xf32>, vector<128x64xf32>, vector<8x64xf32> -> vector<8x64xf32>
    %c16 = arith.constant 16 : index
    %c0_16 = arith.constant 0 : index
    %17 = vector.load %arg15[%c16, %c0_16] : memref<128x64xf32, #tpu.memory_space<vmem>>, vector<8x64xf32>
    tpu.vector_store %arg15[%c16, %c0_16], %16 {strides = array<i32>} : memref<128x64xf32, #tpu.memory_space<vmem>>, vector<8x64xf32>,
    %18 = vector.extract_strided_slice %2 {offsets = [24, 0], sizes = [8, 128], strides = [1, 1]} : vector<128x128xf32> to vector<8x128xf32>
    %c3 = arith.constant 3 : index
    %c0_17 = arith.constant 0 : index
    %c0_18 = arith.constant 0 : index
    %19 = vector.load %arg2[%c3, %c0_17, %c0_18] : memref<16x128x64xf32, #tpu.memory_space<vmem>>, vector<1x128x64xf32>
    %20 = vector.shape_cast %19 : vector<1x128x64xf32> to vector<128x64xf32>
    %cst_19 = arith.constant dense<0.000000e+00> : vector<8x64xf32>
    %21 = tpu.matmul %18, %20, %cst_19 {dimension_numbers = #tpu.dot_dimension_numbers<[1], [0], [0], [1], [0, 0, 1, 1], [], []>} : vector<8x128xf32>, vector<128x64xf32>, vector<8x64xf32> -> vector<8x64xf32>
    %c24 = arith.constant 24 : index
    %c0_20 = arith.constant 0 : index
    %22 = vector.load %arg15[%c24, %c0_20] : memref<128x64xf32, #tpu.memory_space<vmem>>, vector<8x64xf32>
    tpu.vector_store %arg15[%c24, %c0_20], %21 {strides = array<i32>} : memref<128x64xf32, #tpu.memory_space<vmem>>, vector<8x64xf32>,
    %23 = vector.extract_strided_slice %2 {offsets = [32, 0], sizes = [8, 128], strides = [1, 1]} : vector<128x128xf32> to vector<8x128xf32>
    %c4 = arith.constant 4 : index
    %c0_21 = arith.constant 0 : index
    %c0_22 = arith.constant 0 : index
    %24 = vector.load %arg2[%c4, %c0_21, %c0_22] : memref<16x128x64xf32, #tpu.memory_space<vmem>>, vector<1x128x64xf32>
    %25 = vector.shape_cast %24 : vector<1x128x64xf32> to vector<128x64xf32>
    %cst_23 = arith.constant dense<0.000000e+00> : vector<8x64xf32>
    %26 = tpu.matmul %23, %25, %cst_23 {dimension_numbers = #tpu.dot_dimension_numbers<[1], [0], [0], [1], [0, 0, 1, 1], [], []>} : vector<8x128xf32>, vector<128x64xf32>, vector<8x64xf32> -> vector<8x64xf32>
    %c32 = arith.constant 32 : index
    %c0_24 = arith.constant 0 : index
    %27 = vector.load %arg15[%c32, %c0_24] : memref<128x64xf32, #tpu.memory_space<vmem>>, vector<8x64xf32>
    tpu.vector_store %arg15[%c32, %c0_24], %26 {strides = array<i32>} : memref<128x64xf32, #tpu.memory_space<vmem>>, vector<8x64xf32>,
    %28 = vector.extract_strided_slice %2 {offsets = [40, 0], sizes = [8, 128], strides = [1, 1]} : vector<128x128xf32> to vector<8x128xf32>
    %c5 = arith.constant 5 : index
    %c0_25 = arith.constant 0 : index
    %c0_26 = arith.constant 0 : index
    %29 = vector.load %arg2[%c5, %c0_25, %c0_26] : memref<16x128x64xf32, #tpu.memory_space<vmem>>, vector<1x128x64xf32>
    %30 = vector.shape_cast %29 : vector<1x128x64xf32> to vector<128x64xf32>
    %cst_27 = arith.constant dense<0.000000e+00> : vector<8x64xf32>
    %31 = tpu.matmul %28, %30, %cst_27 {dimension_numbers = #tpu.dot_dimension_numbers<[1], [0], [0], [1], [0, 0, 1, 1], [], []>} : vector<8x128xf32>, vector<128x64xf32>, vector<8x64xf32> -> vector<8x64xf32>
    %c40 = arith.constant 40 : index
    %c0_28 = arith.constant 0 : index
    %32 = vector.load %arg15[%c40, %c0_28] : memref<128x64xf32, #tpu.memory_space<vmem>>, vector<8x64xf32>
    tpu.vector_store %arg15[%c40, %c0_28], %31 {strides = array<i32>} : memref<128x64xf32, #tpu.memory_space<vmem>>, vector<8x64xf32>,
    %33 = vector.extract_strided_slice %2 {offsets = [48, 0], sizes = [8, 128], strides = [1, 1]} : vector<128x128xf32> to vector<8x128xf32>
    %c6 = arith.constant 6 : index
    %c0_29 = arith.constant 0 : index
    %c0_30 = arith.constant 0 : index
    %34 = vector.load %arg2[%c6, %c0_29, %c0_30] : memref<16x128x64xf32, #tpu.memory_space<vmem>>, vector<1x128x64xf32>
    %35 = vector.shape_cast %34 : vector<1x128x64xf32> to vector<128x64xf32>
    %cst_31 = arith.constant dense<0.000000e+00> : vector<8x64xf32>
    %36 = tpu.matmul %33, %35, %cst_31 {dimension_numbers = #tpu.dot_dimension_numbers<[1], [0], [0], [1], [0, 0, 1, 1], [], []>} : vector<8x128xf32>, vector<128x64xf32>, vector<8x64xf32> -> vector<8x64xf32>
    %c48 = arith.constant 48 : index
    %c0_32 = arith.constant 0 : index
    %37 = vector.load %arg15[%c48, %c0_32] : memref<128x64xf32, #tpu.memory_space<vmem>>, vector<8x64xf32>
    tpu.vector_store %arg15[%c48, %c0_32], %36 {strides = array<i32>} : memref<128x64xf32, #tpu.memory_space<vmem>>, vector<8x64xf32>,
    %38 = vector.extract_strided_slice %2 {offsets = [56, 0], sizes = [8, 128], strides = [1, 1]} : vector<128x128xf32> to vector<8x128xf32>
    %c7 = arith.constant 7 : index
    %c0_33 = arith.constant 0 : index
    %c0_34 = arith.constant 0 : index
    %39 = vector.load %arg2[%c7, %c0_33, %c0_34] : memref<16x128x64xf32, #tpu.memory_space<vmem>>, vector<1x128x64xf32>
    %40 = vector.shape_cast %39 : vector<1x128x64xf32> to vector<128x64xf32>
    %cst_35 = arith.constant dense<0.000000e+00> : vector<8x64xf32>
    %41 = tpu.matmul %38, %40, %cst_35 {dimension_numbers = #tpu.dot_dimension_numbers<[1], [0], [0], [1], [0, 0, 1, 1], [], []>} : vector<8x128xf32>, vector<128x64xf32>, vector<8x64xf32> -> vector<8x64xf32>
    %c56 = arith.constant 56 : index
    %c0_36 = arith.constant 0 : index
    %42 = vector.load %arg15[%c56, %c0_36] : memref<128x64xf32, #tpu.memory_space<vmem>>, vector<8x64xf32>
    tpu.vector_store %arg15[%c56, %c0_36], %41 {strides = array<i32>} : memref<128x64xf32, #tpu.memory_space<vmem>>, vector<8x64xf32>,
    %43 = vector.extract_strided_slice %2 {offsets = [64, 0], sizes = [8, 128], strides = [1, 1]} : vector<128x128xf32> to vector<8x128xf32>
    %c8_37 = arith.constant 8 : index
    %c0_38 = arith.constant 0 : index
    %c0_39 = arith.constant 0 : index
    %44 = vector.load %arg2[%c8_37, %c0_38, %c0_39] : memref<16x128x64xf32, #tpu.memory_space<vmem>>, vector<1x128x64xf32>
    %45 = vector.shape_cast %44 : vector<1x128x64xf32> to vector<128x64xf32>
    %cst_40 = arith.constant dense<0.000000e+00> : vector<8x64xf32>
    %46 = tpu.matmul %43, %45, %cst_40 {dimension_numbers = #tpu.dot_dimension_numbers<[1], [0], [0], [1], [0, 0, 1, 1], [], []>} : vector<8x128xf32>, vector<128x64xf32>, vector<8x64xf32> -> vector<8x64xf32>
    %c64 = arith.constant 64 : index
    %c0_41 = arith.constant 0 : index
    %47 = vector.load %arg15[%c64, %c0_41] : memref<128x64xf32, #tpu.memory_space<vmem>>, vector<8x64xf32>
    tpu.vector_store %arg15[%c64, %c0_41], %46 {strides = array<i32>} : memref<128x64xf32, #tpu.memory_space<vmem>>, vector<8x64xf32>,
    %48 = vector.extract_strided_slice %2 {offsets = [72, 0], sizes = [8, 128], strides = [1, 1]} : vector<128x128xf32> to vector<8x128xf32>
    %c9 = arith.constant 9 : index
    %c0_42 = arith.constant 0 : index
    %c0_43 = arith.constant 0 : index
    %49 = vector.load %arg2[%c9, %c0_42, %c0_43] : memref<16x128x64xf32, #tpu.memory_space<vmem>>, vector<1x128x64xf32>
    %50 = vector.shape_cast %49 : vector<1x128x64xf32> to vector<128x64xf32>
    %cst_44 = arith.constant dense<0.000000e+00> : vector<8x64xf32>
    %51 = tpu.matmul %48, %50, %cst_44 {dimension_numbers = #tpu.dot_dimension_numbers<[1], [0], [0], [1], [0, 0, 1, 1], [], []>} : vector<8x128xf32>, vector<128x64xf32>, vector<8x64xf32> -> vector<8x64xf32>
    %c72 = arith.constant 72 : index
    %c0_45 = arith.constant 0 : index
    %52 = vector.load %arg15[%c72, %c0_45] : memref<128x64xf32, #tpu.memory_space<vmem>>, vector<8x64xf32>
    tpu.vector_store %arg15[%c72, %c0_45], %51 {strides = array<i32>} : memref<128x64xf32, #tpu.memory_space<vmem>>, vector<8x64xf32>,
    %53 = vector.extract_strided_slice %2 {offsets = [80, 0], sizes = [8, 128], strides = [1, 1]} : vector<128x128xf32> to vector<8x128xf32>
    %c10 = arith.constant 10 : index
    %c0_46 = arith.constant 0 : index
    %c0_47 = arith.constant 0 : index
    %54 = vector.load %arg2[%c10, %c0_46, %c0_47] : memref<16x128x64xf32, #tpu.memory_space<vmem>>, vector<1x128x64xf32>
    %55 = vector.shape_cast %54 : vector<1x128x64xf32> to vector<128x64xf32>
    %cst_48 = arith.constant dense<0.000000e+00> : vector<8x64xf32>
    %56 = tpu.matmul %53, %55, %cst_48 {dimension_numbers = #tpu.dot_dimension_numbers<[1], [0], [0], [1], [0, 0, 1, 1], [], []>} : vector<8x128xf32>, vector<128x64xf32>, vector<8x64xf32> -> vector<8x64xf32>
    %c80 = arith.constant 80 : index
    %c0_49 = arith.constant 0 : index
    %57 = vector.load %arg15[%c80, %c0_49] : memref<128x64xf32, #tpu.memory_space<vmem>>, vector<8x64xf32>
    tpu.vector_store %arg15[%c80, %c0_49], %56 {strides = array<i32>} : memref<128x64xf32, #tpu.memory_space<vmem>>, vector<8x64xf32>,
    %58 = vector.extract_strided_slice %2 {offsets = [88, 0], sizes = [8, 128], strides = [1, 1]} : vector<128x128xf32> to vector<8x128xf32>
    %c11 = arith.constant 11 : index
    %c0_50 = arith.constant 0 : index
    %c0_51 = arith.constant 0 : index
    %59 = vector.load %arg2[%c11, %c0_50, %c0_51] : memref<16x128x64xf32, #tpu.memory_space<vmem>>, vector<1x128x64xf32>
    %60 = vector.shape_cast %59 : vector<1x128x64xf32> to vector<128x64xf32>
    %cst_52 = arith.constant dense<0.000000e+00> : vector<8x64xf32>
    %61 = tpu.matmul %58, %60, %cst_52 {dimension_numbers = #tpu.dot_dimension_numbers<[1], [0], [0], [1], [0, 0, 1, 1], [], []>} : vector<8x128xf32>, vector<128x64xf32>, vector<8x64xf32> -> vector<8x64xf32>
    %c88 = arith.constant 88 : index
    %c0_53 = arith.constant 0 : index
    %62 = vector.load %arg15[%c88, %c0_53] : memref<128x64xf32, #tpu.memory_space<vmem>>, vector<8x64xf32>
    tpu.vector_store %arg15[%c88, %c0_53], %61 {strides = array<i32>} : memref<128x64xf32, #tpu.memory_space<vmem>>, vector<8x64xf32>,
    %63 = vector.extract_strided_slice %2 {offsets = [96, 0], sizes = [8, 128], strides = [1, 1]} : vector<128x128xf32> to vector<8x128xf32>
    %c12 = arith.constant 12 : index
    %c0_54 = arith.constant 0 : index
    %c0_55 = arith.constant 0 : index
    %64 = vector.load %arg2[%c12, %c0_54, %c0_55] : memref<16x128x64xf32, #tpu.memory_space<vmem>>, vector<1x128x64xf32>
    %65 = vector.shape_cast %64 : vector<1x128x64xf32> to vector<128x64xf32>
    %cst_56 = arith.constant dense<0.000000e+00> : vector<8x64xf32>
    %66 = tpu.matmul %63, %65, %cst_56 {dimension_numbers = #tpu.dot_dimension_numbers<[1], [0], [0], [1], [0, 0, 1, 1], [], []>} : vector<8x128xf32>, vector<128x64xf32>, vector<8x64xf32> -> vector<8x64xf32>
    %c96 = arith.constant 96 : index
    %c0_57 = arith.constant 0 : index
    %67 = vector.load %arg15[%c96, %c0_57] : memref<128x64xf32, #tpu.memory_space<vmem>>, vector<8x64xf32>
    tpu.vector_store %arg15[%c96, %c0_57], %66 {strides = array<i32>} : memref<128x64xf32, #tpu.memory_space<vmem>>, vector<8x64xf32>,
    %68 = vector.extract_strided_slice %2 {offsets = [104, 0], sizes = [8, 128], strides = [1, 1]} : vector<128x128xf32> to vector<8x128xf32>
    %c13 = arith.constant 13 : index
    %c0_58 = arith.constant 0 : index
    %c0_59 = arith.constant 0 : index
    %69 = vector.load %arg2[%c13, %c0_58, %c0_59] : memref<16x128x64xf32, #tpu.memory_space<vmem>>, vector<1x128x64xf32>
    %70 = vector.shape_cast %69 : vector<1x128x64xf32> to vector<128x64xf32>
    %cst_60 = arith.constant dense<0.000000e+00> : vector<8x64xf32>
    %71 = tpu.matmul %68, %70, %cst_60 {dimension_numbers = #tpu.dot_dimension_numbers<[1], [0], [0], [1], [0, 0, 1, 1], [], []>} : vector<8x128xf32>, vector<128x64xf32>, vector<8x64xf32> -> vector<8x64xf32>
    %c104 = arith.constant 104 : index
    %c0_61 = arith.constant 0 : index
    %72 = vector.load %arg15[%c104, %c0_61] : memref<128x64xf32, #tpu.memory_space<vmem>>, vector<8x64xf32>
    tpu.vector_store %arg15[%c104, %c0_61], %71 {strides = array<i32>} : memref<128x64xf32, #tpu.memory_space<vmem>>, vector<8x64xf32>,
    %73 = vector.extract_strided_slice %2 {offsets = [112, 0], sizes = [8, 128], strides = [1, 1]} : vector<128x128xf32> to vector<8x128xf32>
    %c14 = arith.constant 14 : index
    %c0_62 = arith.constant 0 : index
    %c0_63 = arith.constant 0 : index
    %74 = vector.load %arg2[%c14, %c0_62, %c0_63] : memref<16x128x64xf32, #tpu.memory_space<vmem>>, vector<1x128x64xf32>
    %75 = vector.shape_cast %74 : vector<1x128x64xf32> to vector<128x64xf32>
    %cst_64 = arith.constant dense<0.000000e+00> : vector<8x64xf32>
    %76 = tpu.matmul %73, %75, %cst_64 {dimension_numbers = #tpu.dot_dimension_numbers<[1], [0], [0], [1], [0, 0, 1, 1], [], []>} : vector<8x128xf32>, vector<128x64xf32>, vector<8x64xf32> -> vector<8x64xf32>
    %c112 = arith.constant 112 : index
    %c0_65 = arith.constant 0 : index
    %77 = vector.load %arg15[%c112, %c0_65] : memref<128x64xf32, #tpu.memory_space<vmem>>, vector<8x64xf32>
    tpu.vector_store %arg15[%c112, %c0_65], %76 {strides = array<i32>} : memref<128x64xf32, #tpu.memory_space<vmem>>, vector<8x64xf32>,
    %78 = vector.extract_strided_slice %2 {offsets = [120, 0], sizes = [8, 128], strides = [1, 1]} : vector<128x128xf32> to vector<8x128xf32>
    %c15 = arith.constant 15 : index
    %c0_66 = arith.constant 0 : index
    %c0_67 = arith.constant 0 : index
    %79 = vector.load %arg2[%c15, %c0_66, %c0_67] : memref<16x128x64xf32, #tpu.memory_space<vmem>>, vector<1x128x64xf32>
    %80 = vector.shape_cast %79 : vector<1x128x64xf32> to vector<128x64xf32>
    %cst_68 = arith.constant dense<0.000000e+00> : vector<8x64xf32>
    %81 = tpu.matmul %78, %80, %cst_68 {dimension_numbers = #tpu.dot_dimension_numbers<[1], [0], [0], [1], [0, 0, 1, 1], [], []>} : vector<8x128xf32>, vector<128x64xf32>, vector<8x64xf32> -> vector<8x64xf32>
    %c120 = arith.constant 120 : index
    %c0_69 = arith.constant 0 : index
    %82 = vector.load %arg15[%c120, %c0_69] : memref<128x64xf32, #tpu.memory_space<vmem>>, vector<8x64xf32>
    tpu.vector_store %arg15[%c120, %c0_69], %81 {strides = array<i32>} : memref<128x64xf32, #tpu.memory_space<vmem>>, vector<8x64xf32>,
    %cst_70 = arith.constant 0.000000e+00 : f32
    %83 = vector.broadcast %cst_70 : f32 to vector<16x64xf32>
    %c0_71 = arith.constant 0 : index
    %c0_72 = arith.constant 0 : index
    %84 = tpu.strided_load %arg15[%c0_71, %c0_72] {strides = array<i32: 8, 1>} : memref<128x64xf32, #tpu.memory_space<vmem>>, vector<16x64xf32>
    %c0_73 = arith.constant 0 : index
    %c0_74 = arith.constant 0 : index
    %c0_75 = arith.constant 0 : index
    %85 = vector.load %arg4[%c0_73, %c0_74, %c0_75] : memref<8x64x64xf32, #tpu.memory_space<vmem>>, vector<1x64x64xf32>
    %86 = vector.shape_cast %85 : vector<1x64x64xf32> to vector<64x64xf32>
    %cst_76 = arith.constant dense<0.000000e+00> : vector<16x64xf32>
    %87 = tpu.matmul %84, %86, %cst_76 {dimension_numbers = #tpu.dot_dimension_numbers<[1], [0], [0], [1], [0, 0, 1, 1], [], []>} : vector<16x64xf32>, vector<64x64xf32>, vector<16x64xf32> -> vector<16x64xf32>
    %88 = arith.addf %83, %87 : vector<16x64xf32>
    %c1_77 = arith.constant 1 : index
    %c0_78 = arith.constant 0 : index
    %89 = tpu.strided_load %arg15[%c1_77, %c0_78] {strides = array<i32: 8, 1>} : memref<128x64xf32, #tpu.memory_space<vmem>>, vector<16x64xf32>
    %c1_79 = arith.constant 1 : index
    %c0_80 = arith.constant 0 : index
    %c0_81 = arith.constant 0 : index
    %90 = vector.load %arg4[%c1_79, %c0_80, %c0_81] : memref<8x64x64xf32, #tpu.memory_space<vmem>>, vector<1x64x64xf32>
    %91 = vector.shape_cast %90 : vector<1x64x64xf32> to vector<64x64xf32>
    %cst_82 = arith.constant dense<0.000000e+00> : vector<16x64xf32>
    %92 = tpu.matmul %89, %91, %cst_82 {dimension_numbers = #tpu.dot_dimension_numbers<[1], [0], [0], [1], [0, 0, 1, 1], [], []>} : vector<16x64xf32>, vector<64x64xf32>, vector<16x64xf32> -> vector<16x64xf32>
    %93 = arith.addf %88, %92 : vector<16x64xf32>
    %c2_83 = arith.constant 2 : index
    %c0_84 = arith.constant 0 : index
    %94 = tpu.strided_load %arg15[%c2_83, %c0_84] {strides = array<i32: 8, 1>} : memref<128x64xf32, #tpu.memory_space<vmem>>, vector<16x64xf32>
    %c2_85 = arith.constant 2 : index
    %c0_86 = arith.constant 0 : index
    %c0_87 = arith.constant 0 : index
    %95 = vector.load %arg4[%c2_85, %c0_86, %c0_87] : memref<8x64x64xf32, #tpu.memory_space<vmem>>, vector<1x64x64xf32>
    %96 = vector.shape_cast %95 : vector<1x64x64xf32> to vector<64x64xf32>
    %cst_88 = arith.constant dense<0.000000e+00> : vector<16x64xf32>
    %97 = tpu.matmul %94, %96, %cst_88 {dimension_numbers = #tpu.dot_dimension_numbers<[1], [0], [0], [1], [0, 0, 1, 1], [], []>} : vector<16x64xf32>, vector<64x64xf32>, vector<16x64xf32> -> vector<16x64xf32>
    %98 = arith.addf %93, %97 : vector<16x64xf32>
    %c3_89 = arith.constant 3 : index
    %c0_90 = arith.constant 0 : index
    %99 = tpu.strided_load %arg15[%c3_89, %c0_90] {strides = array<i32: 8, 1>} : memref<128x64xf32, #tpu.memory_space<vmem>>, vector<16x64xf32>
    %c3_91 = arith.constant 3 : index
    %c0_92 = arith.constant 0 : index
    %c0_93 = arith.constant 0 : index
    %100 = vector.load %arg4[%c3_91, %c0_92, %c0_93] : memref<8x64x64xf32, #tpu.memory_space<vmem>>, vector<1x64x64xf32>
    %101 = vector.shape_cast %100 : vector<1x64x64xf32> to vector<64x64xf32>
    %cst_94 = arith.constant dense<0.000000e+00> : vector<16x64xf32>
    %102 = tpu.matmul %99, %101, %cst_94 {dimension_numbers = #tpu.dot_dimension_numbers<[1], [0], [0], [1], [0, 0, 1, 1], [], []>} : vector<16x64xf32>, vector<64x64xf32>, vector<16x64xf32> -> vector<16x64xf32>
    %103 = arith.addf %98, %102 : vector<16x64xf32>
    %c4_95 = arith.constant 4 : index
    %c0_96 = arith.constant 0 : index
    %104 = tpu.strided_load %arg15[%c4_95, %c0_96] {strides = array<i32: 8, 1>} : memref<128x64xf32, #tpu.memory_space<vmem>>, vector<16x64xf32>
    %c4_97 = arith.constant 4 : index
    %c0_98 = arith.constant 0 : index
    %c0_99 = arith.constant 0 : index
    %105 = vector.load %arg4[%c4_97, %c0_98, %c0_99] : memref<8x64x64xf32, #tpu.memory_space<vmem>>, vector<1x64x64xf32>
    %106 = vector.shape_cast %105 : vector<1x64x64xf32> to vector<64x64xf32>
    %cst_100 = arith.constant dense<0.000000e+00> : vector<16x64xf32>
    %107 = tpu.matmul %104, %106, %cst_100 {dimension_numbers = #tpu.dot_dimension_numbers<[1], [0], [0], [1], [0, 0, 1, 1], [], []>} : vector<16x64xf32>, vector<64x64xf32>, vector<16x64xf32> -> vector<16x64xf32>
    %108 = arith.addf %103, %107 : vector<16x64xf32>
    %c5_101 = arith.constant 5 : index
    %c0_102 = arith.constant 0 : index
    %109 = tpu.strided_load %arg15[%c5_101, %c0_102] {strides = array<i32: 8, 1>} : memref<128x64xf32, #tpu.memory_space<vmem>>, vector<16x64xf32>
    %c5_103 = arith.constant 5 : index
    %c0_104 = arith.constant 0 : index
    %c0_105 = arith.constant 0 : index
    %110 = vector.load %arg4[%c5_103, %c0_104, %c0_105] : memref<8x64x64xf32, #tpu.memory_space<vmem>>, vector<1x64x64xf32>
    %111 = vector.shape_cast %110 : vector<1x64x64xf32> to vector<64x64xf32>
    %cst_106 = arith.constant dense<0.000000e+00> : vector<16x64xf32>
    %112 = tpu.matmul %109, %111, %cst_106 {dimension_numbers = #tpu.dot_dimension_numbers<[1], [0], [0], [1], [0, 0, 1, 1], [], []>} : vector<16x64xf32>, vector<64x64xf32>, vector<16x64xf32> -> vector<16x64xf32>
    %113 = arith.addf %108, %112 : vector<16x64xf32>
    %c6_107 = arith.constant 6 : index
    %c0_108 = arith.constant 0 : index
    %114 = tpu.strided_load %arg15[%c6_107, %c0_108] {strides = array<i32: 8, 1>} : memref<128x64xf32, #tpu.memory_space<vmem>>, vector<16x64xf32>
    %c6_109 = arith.constant 6 : index
    %c0_110 = arith.constant 0 : index
    %c0_111 = arith.constant 0 : index
    %115 = vector.load %arg4[%c6_109, %c0_110, %c0_111] : memref<8x64x64xf32, #tpu.memory_space<vmem>>, vector<1x64x64xf32>
    %116 = vector.shape_cast %115 : vector<1x64x64xf32> to vector<64x64xf32>
    %cst_112 = arith.constant dense<0.000000e+00> : vector<16x64xf32>
    %117 = tpu.matmul %114, %116, %cst_112 {dimension_numbers = #tpu.dot_dimension_numbers<[1], [0], [0], [1], [0, 0, 1, 1], [], []>} : vector<16x64xf32>, vector<64x64xf32>, vector<16x64xf32> -> vector<16x64xf32>
    %118 = arith.addf %113, %117 : vector<16x64xf32>
    %c7_113 = arith.constant 7 : index
    %c0_114 = arith.constant 0 : index
    %119 = tpu.strided_load %arg15[%c7_113, %c0_114] {strides = array<i32: 8, 1>} : memref<128x64xf32, #tpu.memory_space<vmem>>, vector<16x64xf32>
    %c7_115 = arith.constant 7 : index
    %c0_116 = arith.constant 0 : index
    %c0_117 = arith.constant 0 : index
    %120 = vector.load %arg4[%c7_115, %c0_116, %c0_117] : memref<8x64x64xf32, #tpu.memory_space<vmem>>, vector<1x64x64xf32>
    %121 = vector.shape_cast %120 : vector<1x64x64xf32> to vector<64x64xf32>
    %cst_118 = arith.constant dense<0.000000e+00> : vector<16x64xf32>
    %122 = tpu.matmul %119, %121, %cst_118 {dimension_numbers = #tpu.dot_dimension_numbers<[1], [0], [0], [1], [0, 0, 1, 1], [], []>} : vector<16x64xf32>, vector<64x64xf32>, vector<16x64xf32> -> vector<16x64xf32>
    %123 = arith.addf %118, %122 : vector<16x64xf32>
    %c0_119 = arith.constant 0 : index
    %c0_120 = arith.constant 0 : index
    %124 = vector.load %arg5[%c0_119, %c0_120] : memref<1x64xf32, #tpu.memory_space<vmem>>, vector<1x64xf32>
    %125 = vector.broadcast %124 : vector<1x64xf32> to vector<16x64xf32>
    %126 = arith.addf %123, %125 : vector<16x64xf32>
    %cst_121 = arith.constant 0.000000e+00 : f32
    %127 = vector.broadcast %cst_121 : f32 to vector<16x64xf32>
    %128 = arith.maximumf %126, %127 : vector<16x64xf32>
    %c0_122 = arith.constant 0 : index
    %c0_123 = arith.constant 0 : index
    %129 = vector.load %arg6[%c0_122, %c0_123] : memref<64x64xf32, #tpu.memory_space<vmem>>, vector<64x64xf32>
    %cst_124 = arith.constant dense<0.000000e+00> : vector<16x64xf32>
    %130 = tpu.matmul %128, %129, %cst_124 {dimension_numbers = #tpu.dot_dimension_numbers<[1], [0], [0], [1], [0, 0, 1, 1], [], []>} : vector<16x64xf32>, vector<64x64xf32>, vector<16x64xf32> -> vector<16x64xf32>
    %c0_125 = arith.constant 0 : index
    %c0_126 = arith.constant 0 : index
    %131 = vector.load %arg7[%c0_125, %c0_126] : memref<1x64xf32, #tpu.memory_space<vmem>>, vector<1x64xf32>
    %132 = vector.broadcast %131 : vector<1x64xf32> to vector<16x64xf32>
    %133 = arith.addf %130, %132 : vector<16x64xf32>
    %cst_127 = arith.constant 0.000000e+00 : f32
    %134 = vector.broadcast %cst_127 : f32 to vector<16x64xf32>
    %135 = arith.maximumf %133, %134 : vector<16x64xf32>
    %136 = arith.mulf %135, %135 : vector<16x64xf32>
    %cst_128 = arith.constant dense<0.000000e+00> : vector<16xf32>
    %137 = vector.multi_reduction <add>, %136, %cst_128 [1] : vector<16x64xf32> to vector<16xf32>
    %138 = vector.shape_cast %137 : vector<16xf32> to vector<16x1xf32>
    %cst_129 = arith.constant 1.000000e-10 : f32
    %139 = vector.broadcast %cst_129 : f32 to vector<16x1xf32>
    %140 = arith.addf %138, %139 : vector<16x1xf32>
    %141 = math.rsqrt %140 : vector<16x1xf32>
    %142 = vector.broadcast %141 : vector<16x1xf32> to vector<16x64xf32>
    %143 = arith.mulf %135, %142 : vector<16x64xf32>
    %c0_130 = arith.constant 0 : index
    %c0_131 = arith.constant 0 : index
    %144 = vector.load %arg8[%c0_130, %c0_131] : memref<64x16xf32, #tpu.memory_space<vmem>>, vector<64x16xf32>
    %145 = arith.mulf %144, %144 : vector<64x16xf32>
    %cst_132 = arith.constant dense<0.000000e+00> : vector<16xf32>
    %146 = vector.multi_reduction <add>, %145, %cst_132 [0] : vector<64x16xf32> to vector<16xf32>
    %147 = vector.shape_cast %146 : vector<16xf32> to vector<1x16xf32>
    %cst_133 = arith.constant 1.000000e-10 : f32
    %148 = vector.broadcast %cst_133 : f32 to vector<1x16xf32>
    %149 = arith.addf %147, %148 : vector<1x16xf32>
    %150 = math.rsqrt %149 : vector<1x16xf32>
    %151 = vector.broadcast %150 : vector<1x16xf32> to vector<64x16xf32>
    %152 = arith.mulf %144, %151 : vector<64x16xf32>
    %cst_134 = arith.constant dense<0.000000e+00> : vector<16x16xf32>
    %153 = tpu.matmul %143, %152, %cst_134 {dimension_numbers = #tpu.dot_dimension_numbers<[1], [0], [0], [1], [0, 0, 1, 1], [], []>} : vector<16x64xf32>, vector<64x16xf32>, vector<16x16xf32> -> vector<16x16xf32>
    %cst_135 = arith.constant 2.000000e+01 : f32
    %154 = vector.broadcast %cst_135 : f32 to vector<16x16xf32>
    %155 = arith.mulf %154, %153 : vector<16x16xf32>
    %cst_136 = arith.constant dense<0xFF800000> : vector<16xf32>
    %156 = vector.multi_reduction <maximumf>, %155, %cst_136 [1] : vector<16x16xf32> to vector<16xf32>
    %157 = vector.shape_cast %156 : vector<16xf32> to vector<16x1xf32>
    %158 = vector.broadcast %157 : vector<16x1xf32> to vector<16x16xf32>
    %159 = arith.subf %155, %158 : vector<16x16xf32>
    %160 = math.exp %159 : vector<16x16xf32>
    %cst_137 = arith.constant dense<0.000000e+00> : vector<16xf32>
    %161 = vector.multi_reduction <add>, %160, %cst_137 [1] : vector<16x16xf32> to vector<16xf32>
    %162 = vector.shape_cast %161 : vector<16xf32> to vector<16x1xf32>
    %163 = vector.broadcast %162 : vector<16x1xf32> to vector<16x16xf32>
    %164 = arith.divf %160, %163 : vector<16x16xf32>
    %c0_138 = arith.constant 0 : index
    %c0_139 = arith.constant 0 : index
    %165 = vector.load %arg13[%c0_138, %c0_139] : memref<16x16xf32, #tpu.memory_space<vmem>>, vector<16x16xf32>
    tpu.vector_store %arg13[%c0_138, %c0_139], %164 {strides = array<i32>} : memref<16x16xf32, #tpu.memory_space<vmem>>, vector<16x16xf32>,
    %c0_140 = arith.constant 0 : index
    %c0_141 = arith.constant 0 : index
    %166 = vector.load %arg9[%c0_140, %c0_141] : memref<64x4xf32, #tpu.memory_space<vmem>>, vector<64x4xf32>
    %cst_142 = arith.constant dense<0.000000e+00> : vector<16x4xf32>
    %167 = tpu.matmul %135, %166, %cst_142 {dimension_numbers = #tpu.dot_dimension_numbers<[1], [0], [0], [1], [0, 0, 1, 1], [], []>} : vector<16x64xf32>, vector<64x4xf32>, vector<16x4xf32> -> vector<16x4xf32>
    %c0_143 = arith.constant 0 : index
    %c0_144 = arith.constant 0 : index
    %168 = vector.load %arg10[%c0_143, %c0_144] : memref<1x4xf32, #tpu.memory_space<vmem>>, vector<1x4xf32>
    %169 = vector.broadcast %168 : vector<1x4xf32> to vector<16x4xf32>
    %170 = arith.addf %167, %169 : vector<16x4xf32>
    %c0_145 = arith.constant 0 : index
    %c0_146 = arith.constant 0 : index
    %171 = vector.load %arg3[%c0_145, %c0_146] : memref<16x4xf32, #tpu.memory_space<vmem>>, vector<16x4xf32>
    %c0_147 = arith.constant 0 : index
    %c0_148 = arith.constant 0 : index
    %172 = vector.load %arg11[%c0_147, %c0_148] : memref<4x8xf32, #tpu.memory_space<vmem>>, vector<4x8xf32>
    %cst_149 = arith.constant dense<0.000000e+00> : vector<16x8xf32>
    %173 = tpu.matmul %171, %172, %cst_149 {dimension_numbers = #tpu.dot_dimension_numbers<[1], [0], [0], [1], [0, 0, 1, 1], [], []>} : vector<16x4xf32>, vector<4x8xf32>, vector<16x8xf32> -> vector<16x8xf32>
    %c0_150 = arith.constant 0 : index
    %c0_151 = arith.constant 0 : index
    %174 = vector.load %arg12[%c0_150, %c0_151] : memref<4x8xf32, #tpu.memory_space<vmem>>, vector<4x8xf32>
    %cst_152 = arith.constant dense<0.000000e+00> : vector<16x8xf32>
    %175 = tpu.matmul %170, %174, %cst_152 {dimension_numbers = #tpu.dot_dimension_numbers<[1], [0], [0], [1], [0, 0, 1, 1], [], []>} : vector<16x4xf32>, vector<4x8xf32>, vector<16x8xf32> -> vector<16x8xf32>
    %176 = vector.extract_strided_slice %173 {offsets = [0, 0], sizes = [16, 4], strides = [1, 1]} : vector<16x8xf32> to vector<16x4xf32>
    %177 = vector.extract_strided_slice %173 {offsets = [0, 4], sizes = [16, 4], strides = [1, 1]} : vector<16x8xf32> to vector<16x4xf32>
    %178 = vector.extract_strided_slice %175 {offsets = [0, 0], sizes = [16, 4], strides = [1, 1]} : vector<16x8xf32> to vector<16x4xf32>
    %179 = vector.extract_strided_slice %175 {offsets = [0, 4], sizes = [16, 4], strides = [1, 1]} : vector<16x8xf32> to vector<16x4xf32>
    %cst_153 = arith.constant 4.13516665 : f32
    %180 = vector.broadcast %cst_153 : f32 to vector<16x4xf32>
    %181 = arith.minimumf %179, %180 : vector<16x4xf32>
    %182 = tpu.iota {dimensions = array<i32: 1>} : vector<16x4xi32>
    %c2_i32 = arith.constant 2 : i32
    %183 = vector.broadcast %c2_i32 : i32 to vector<16x4xi32>
    %184 = arith.cmpi slt, %182, %183 : vector<16x4xi32>
    %cst_154 = arith.constant -5.000000e-01 : f32
    %cst_155 = arith.constant 5.000000e-01 : f32
    %185 = vector.broadcast %cst_154 : f32 to vector<16x4xf32>
    %186 = vector.broadcast %cst_155 : f32 to vector<16x4xf32>
    %187 = arith.select %184, %185, %186 : vector<16x4xi1>, vector<16x4xf32>
    %c1_i32 = arith.constant 1 : i32
    %188 = vector.broadcast %c1_i32 : i32 to vector<16x4xi32>
    %189 = arith.andi %182, %188 : vector<16x4xi32>
    %c0_i32 = arith.constant 0 : i32
    %190 = vector.broadcast %c0_i32 : i32 to vector<16x4xi32>
    %191 = arith.cmpi eq, %189, %190 : vector<16x4xi32>
    %cst_156 = arith.constant 6.400000e+01 : f32
    %cst_157 = arith.constant 6.400000e+01 : f32
    %192 = vector.broadcast %cst_156 : f32 to vector<16x4xf32>
    %193 = vector.broadcast %cst_157 : f32 to vector<16x4xf32>
    %194 = arith.select %191, %192, %193 : vector<16x4xi1>, vector<16x4xf32>
    %195 = arith.mulf %178, %176 : vector<16x4xf32>
    %196 = arith.addf %177, %195 : vector<16x4xf32>
    %197 = math.exp %181 : vector<16x4xf32>
    %198 = arith.mulf %187, %197 : vector<16x4xf32>
    %199 = arith.mulf %198, %176 : vector<16x4xf32>
    %200 = arith.addf %196, %199 : vector<16x4xf32>
    %cst_158 = arith.constant 0.000000e+00 : f32
    %201 = vector.broadcast %cst_158 : f32 to vector<16x4xf32>
    %202 = arith.maximumf %201, %200 : vector<16x4xf32>
    %203 = arith.minimumf %194, %202 : vector<16x4xf32>
    %c0_159 = arith.constant 0 : index
    %c0_160 = arith.constant 0 : index
    %204 = vector.load %arg14[%c0_159, %c0_160] : memref<16x4xf32, #tpu.memory_space<vmem>>, vector<16x4xf32>
    tpu.vector_store %arg14[%c0_159, %c0_160], %203 {strides = array<i32>} : memref<16x4xf32, #tpu.memory_space<vmem>>, vector<16x4xf32>,
    return
  }
}

</mosaic_0001>

<bundles_post_ra>
// kernel: standard_roi_heads_forward.1
= control target key start
LH: loop header
LB: loop body
LE: loop exit
PB: predicated region body
PF: predicated region fallthrough
CT: control target
= control target key end

     0   :  { %vm67_vm0 = vcmask 261120   ;;  %v5284_v6 = vmov 0.0|0.0   ;;  %s6791_s0 = inlined_call_operand.vmem [shape: f32[128,32], index: 0, kind: input, shape index: {}]   ;;  %s6792_s1 = inlined_call_operand.vmem [shape: f32[32,128], index: 1, kind: input, shape index: {}]   ;;  %s6793_s2 = inlined_call_operand.vmem [shape: f32[16,128,64], index: 2, kind: input, shape index: {}]   ;;  %s6794_s3 = inlined_call_operand.vmem [shape: f32[16,4], index: 3, kind: input, shape index: {}]   ;;  %s6795_s4 = inlined_call_operand.vmem [shape: f32[8,64,64], index: 4, kind: input, shape index: {}]   ;;  %s6796_s5 = inlined_call_operand.vmem [shape: f32[1,64], index: 5, kind: input, shape index: {}]   ;;  %s6797_s6 = inlined_call_operand.vmem [shape: f32[64,64], index: 6, kind: input, shape index: {}]   ;;  %s6798_s7 = inlined_call_operand.vmem [shape: f32[1,64], index: 7, kind: input, shape index: {}]   ;;  %s6799_s8 = inlined_call_operand.vmem [shape: f32[64,16], index: 8, kind: input, shape index: {}]   ;;  %s6800_s9 = inlined_call_operand.vmem [shape: f32[64,4], index: 9, kind: input, shape index: {}]   ;;  %s6801_s10 = inlined_call_operand.vmem [shape: f32[1,4], index: 10, kind: input, shape index: {}]   ;;  %s6802_s11 = inlined_call_operand.vmem [shape: f32[4,8], index: 11, kind: input, shape index: {}]   ;;  %s6803_s12 = inlined_call_operand.vmem [shape: f32[4,8], index: 12, kind: input, shape index: {}]   ;;  %s6804_s13 = inlined_call_operand.hbm [shape: f32[16,16], index: 13, kind: output, shape index: {0}]   ;;  %s6805_s14 = inlined_call_operand.vmem [shape: f32[16,4], index: 14, kind: output, shape index: {1}]  }
   0x1   :  { %v63_v0 = vld [vmem:[%s6792_s1] sm:$0xff]  ;;  %v64_v1 = vld [vmem:[%s6792_s1 + $0x8] sm:$0xff]  ;;  %v65_v2 = vld [vmem:[%s6792_s1 + $0x10] sm:$0xff]  ;;  %4707 = vmatprep.subr.bf16.mxu1 %v5284_v6 }
   0x2   :  { %v4651_v3 = vpack.c.bf16 %v64_v1, %v63_v0  ;;  %v66_v4 = vld [vmem:[%s6792_s1 + $0x18] sm:$0xff]  ;;  %v47_v5 = vld [vmem:[%s6791_s0] sm:$0xff]  ;;  %v262_v9 = vld [vmem:[%s6793_s2 + $0x8] sm:$0xff] }
   0x3   :  { %v4655_v7 = vpack.c.bf16 %v66_v4, %v65_v2  ;;  %3848 = vmatprep.mubr.msk.f32.mxu0 %vm67_vm0, %v47_v5  ;;  %v261_v8 = vld [vmem:[%s6793_s2] sm:$0xff]  ;;  %v48_v10 = vld [vmem:[%s6791_s0 + $0x8] sm:$0xff]  ;;  %v49_v11 = vld [vmem:[%s6791_s0 + $0x10] sm:$0xff] }
   0x4   :  { %4652 = vmatprep.subr.bf16.mxu0 %v4651_v3  ;;  %v4660_v12 = vpack.c.bf16 %v262_v9, %v261_v8  ;;  %v263_v13 = vld [vmem:[%s6793_s2 + $0x10] sm:$0xff]  ;;  %v264_v14 = vld [vmem:[%s6793_s2 + $0x18] sm:$0xff]  ;;  %v3121_v15 = vld [vmem:[%s6793_s2 + $0x100] sm:$0xff] }
   0x5   :  { %4654 = vmatpush3.bf16.msra.mxu0 %v4651_v3  ;;  %v3122_v16 = vld [vmem:[%s6793_s2 + $0x108] sm:$0xff]  ;;  %v3123_v18 = vld [vmem:[%s6793_s2 + $0x110] sm:$0xff]  ;;  %v3124_v19 = vld [vmem:[%s6793_s2 + $0x118] sm:$0xff]  ;;  %v4663_v21 = vpack.c.bf16 %v264_v14, %v263_v13 }
   0x6   :  { %4656 = vmatprep.subr.bf16.mxu0 %v4655_v7  ;;  %v4708_v17 = vpack.c.bf16 %v3122_v16, %v3121_v15  ;;  %v50_v20 = vld [vmem:[%s6791_s0 + $0x18] sm:$0xff]  ;;  %v51_v22 = vld [vmem:[%s6791_s0 + $0x20] sm:$0xff]  ;;  %v266_v24 = vld [vmem:[%s6793_s2 + $0x28] sm:$0xff]  ;;  %v4711_v25 = vpack.c.bf16 %v3124_v19, %v3123_v18 }
   0x7   :  { %v265_v23 = vld [vmem:[%s6793_s2 + $0x20] sm:$0xff]  ;;  %v3126_v27 = vld [vmem:[%s6793_s2 + $0x128] sm:$0xff] }
   0x8   :  { %4709 = vmatpush3.bf16.msra.mxu1 %v4708_v17  ;;  %v3125_v26 = vld [vmem:[%s6793_s2 + $0x120] sm:$0xff] }
   0x9   :  { %4658 = vmatpush3.bf16.msra.mxu0 %v4655_v7  ;;  %4710 = vmatprep.subr.bf16.mxu1 %v5284_v6 }
   0xa   :  { %4659 = vmatprep.subr.bf16.mxu0 %v5284_v6 }
   0xc   :  { %3849 = vmatmul.mubr.msk.f32.vlgmr.msra.gmra.mrb[0].mxu0 %vm67_vm0, %v48_v10 }
   0xd   :  { %3851 = vmatprep.mubr.msk.f32.mxu0 %vm67_vm0, %v49_v11  ;;  %4661 = vmatpush3.bf16.msra.mxu0 %v4660_v12 }
   0xe   :  { %4662 = vmatprep.subr.bf16.mxu0 %v5284_v6 }
   0xf   :  { %20 = vsyncpa [#allocation4], 0  ;;  %v52_v28 = vld [vmem:[%s6791_s0 + $0x28] sm:$0xff]  ;;  %v4666_v29 = vpack.c.bf16 %v266_v24, %v265_v23  ;;  %v53_v30 = vld [vmem:[%s6791_s0 + $0x30] sm:$0xff]  ;;  %4712 = vmatpush3.bf16.msra.mxu1 %v4711_v25  ;;  %v4714_v33 = vpack.c.bf16 %v3126_v27, %v3125_v26  ;;  %vm5285_vm1 = vmmov 0   ;;  %v5286_v61 = vmov 0.0  }
  0x10   :  { %3852 = vmatmul.mubr.msk.f32.gmra.mrb[2].mxu0 %vm67_vm0, %v50_v20  ;;  %v267_v31 = vld [vmem:[%s6793_s2 + $0x30] sm:$0xff]  ;;  %v268_v32 = vld [vmem:[%s6793_s2 + $0x38] sm:$0xff]  ;;  %4713 = vmatprep.subr.bf16.mxu1 %v5284_v6  ;;  %v55_v38 = vld [vmem:[%s6791_s0 + $0x40] sm:$0xff]  ;;  %vm347_vm2 = vcmask 523264   ;;  %vm2602_vm3 = vcmask 130048   ;;  %vm2847_vm4 = vcmask 1043456  }
  0x11   :  { %3854 = vmatprep.mubr.msk.f32.mxu0 %vm67_vm0, %v51_v22  ;;  %4664 = vmatpush3.bf16.msra.mxu0 %v4663_v21  ;;  %v3127_v34 = vld [vmem:[%s6793_s2 + $0x130] sm:$0xff]  ;;  %v3128_v35 = vld [vmem:[%s6793_s2 + $0x138] sm:$0xff]  ;;  %v4669_v37 = vpack.c.bf16 %v268_v32, %v267_v31  ;;  %v269_v39 = vld [vmem:[%s6793_s2 + $0x40] sm:$0xff]  ;;  %vm2840_vm5 = vcmask 31744  }
  0x12   :  { %4665 = vmatprep.subr.bf16.mxu0 %v5284_v6  ;;  %v54_v36 = vld [vmem:[%s6791_s0 + $0x38] sm:$0xff]  ;;  %v270_v40 = vld [vmem:[%s6793_s2 + $0x48] sm:$0xff]  ;;  %v4717_v41 = vpack.c.bf16 %v3128_v35, %v3127_v34  ;;  %v57_v44 = vld [vmem:[%s6791_s0 + $0x50] sm:$0xff]  ;;  %3974 = vmatprep.mubr.msk.f32.mxu1 %vm5285_vm1, %v5286_v61 }
  0x13   :  { %4715 = vmatpush3.bf16.msra.mxu1 %v4714_v33  ;;  %v56_v42 = vld [vmem:[%s6791_s0 + $0x48] sm:$0xff]  ;;  %v4672_v43 = vpack.c.bf16 %v270_v40, %v269_v39  ;;  %v271_v45 = vld [vmem:[%s6793_s2 + $0x50] sm:$0xff]  ;;  %v272_v46 = vld [vmem:[%s6793_s2 + $0x58] sm:$0xff] }
  0x14   :  { %3855 = vmatmul.mubr.msk.f32.gmra.mrb[4].mxu0 %vm67_vm0, %v52_v28  ;;  %4716 = vmatprep.subr.bf16.mxu1 %v5284_v6  ;;  %v58_v47 = vld [vmem:[%s6791_s0 + $0x58] sm:$0xff]  ;;  %v4675_v48 = vpack.c.bf16 %v272_v46, %v271_v45  ;;  %v59_v49 = vld [vmem:[%s6791_s0 + $0x60] sm:$0xff]  ;;  %v274_v51 = vld [vmem:[%s6793_s2 + $0x68] sm:$0xff] }
  0x15   :  { %3857 = vmatprep.mubr.msk.f32.mxu0 %vm67_vm0, %v53_v30  ;;  %4667 = vmatpush3.bf16.msra.mxu0 %v4666_v29  ;;  %v273_v50 = vld [vmem:[%s6793_s2 + $0x60] sm:$0xff]  ;;  %v60_v52 = vld [vmem:[%s6791_s0 + $0x68] sm:$0xff]  ;;  %v61_v54 = vld [vmem:[%s6791_s0 + $0x70] sm:$0xff] }
  0x16   :  { %4668 = vmatprep.subr.bf16.mxu0 %v5284_v6  ;;  %v4678_v53 = vpack.c.bf16 %v274_v51, %v273_v50  ;;  %v275_v55 = vld [vmem:[%s6793_s2 + $0x70] sm:$0xff]  ;;  %v276_v56 = vld [vmem:[%s6793_s2 + $0x78] sm:$0xff]  ;;  %v3129_v59 = vld [vmem:[%s6793_s2 + $0x140] sm:$0xff] }
  0x17   :  { %4718 = vmatpush3.bf16.msra.mxu1 %v4717_v41  ;;  %v62_v57 = vld [vmem:[%s6791_s0 + $0x78] sm:$0xff]  ;;  %v4681_v58 = vpack.c.bf16 %v276_v56, %v275_v55  ;;  %v3130_v60 = vld [vmem:[%s6793_s2 + $0x148] sm:$0xff]  ;;  %v3131_v63 = vld [vmem:[%s6793_s2 + $0x150] sm:$0xff] }
  0x18   :  { %3858 = vmatmul.mubr.msk.f32.gmra.mrb[6].mxu0 %vm67_vm0, %v54_v36  ;;  %4719 = vmatprep.subr.bf16.mxu1 %v5284_v6  ;;  %v4720_v62 = vpack.c.bf16 %v3130_v60, %v3129_v59  ;;  %v3132_v0 = vld [vmem:[%s6793_s2 + $0x158] sm:$0xff]  ;;  %v3133_v2 = vld [vmem:[%s6793_s2 + $0x160] sm:$0xff]  ;;  %v3134_v3 = vld [vmem:[%s6793_s2 + $0x168] sm:$0xff] }
  0x19   :  { %3860 = vmatprep.mubr.msk.f32.mxu0 %vm67_vm0, %v55_v38  ;;  %4670 = vmatpush3.bf16.msra.mxu0 %v4669_v37  ;;  %v4723_v1 = vpack.c.bf16 %v3132_v0, %v3131_v63  ;;  %v4726_v4 = vpack.c.bf16 %v3134_v3, %v3133_v2  ;;  %v3135_v5 = vld [vmem:[%s6793_s2 + $0x170] sm:$0xff]  ;;  %v3136_v7 = vld [vmem:[%s6793_s2 + $0x178] sm:$0xff]  ;;  %v3105_v9 = vld [vmem:[%s6793_s2 + $0x80] sm:$0xff] }
  0x1a   :  { %4671 = vmatprep.subr.bf16.mxu0 %v5284_v6  ;;  %v4729_v8 = vpack.c.bf16 %v3136_v7, %v3135_v5  ;;  %v3106_v10 = vld [vmem:[%s6793_s2 + $0x88] sm:$0xff]  ;;  %v3107_v12 = vld [vmem:[%s6793_s2 + $0x90] sm:$0xff]  ;;  %v3108_v14 = vld [vmem:[%s6793_s2 + $0x98] sm:$0xff] }
  0x1b   :  { %4721 = vmatpush3.bf16.msra.mxu1 %v4720_v62  ;;  %v4684_v11 = vpack.c.bf16 %v3106_v10, %v3105_v9  ;;  %v3153_v15 = vld [vmem:[%s6793_s2 + $0x200] sm:$0xff]  ;;  %v3154_v16 = vld [vmem:[%s6793_s2 + $0x208] sm:$0xff]  ;;  %v4687_v18 = vpack.c.bf16 %v3108_v14, %v3107_v12  ;;  %v3155_v23 = vld [vmem:[%s6793_s2 + $0x210] sm:$0xff] }
  0x1c   :  { %3861 = vmatmul.mubr.msk.f32.gmra.mrb[8].mxu0 %vm67_vm0, %v56_v42  ;;  %4722 = vmatprep.subr.bf16.mxu1 %v5284_v6  ;;  %v3109_v19 = vld [vmem:[%s6793_s2 + $0xa0] sm:$0xff]  ;;  %v4756_v20 = vpack.c.bf16 %v3154_v16, %v3153_v15  ;;  %v3110_v21 = vld [vmem:[%s6793_s2 + $0xa8] sm:$0xff]  ;;  %v3156_v24 = vld [vmem:[%s6793_s2 + $0x218] sm:$0xff] }
  0x1d   :  { %3863 = vmatprep.mubr.msk.f32.mxu0 %vm67_vm0, %v57_v44  ;;  %4673 = vmatpush3.bf16.msra.mxu0 %v4672_v43  ;;  %v4690_v26 = vpack.c.bf16 %v3110_v21, %v3109_v19  ;;  %v3111_v27 = vld [vmem:[%s6793_s2 + $0xb0] sm:$0xff]  ;;  %v4759_v28 = vpack.c.bf16 %v3156_v24, %v3155_v23  ;;  %v3112_v29 = vld [vmem:[%s6793_s2 + $0xb8] sm:$0xff]  ;;  %v3157_v30 = vld [vmem:[%s6793_s2 + $0x220] sm:$0xff] }
  0x1e   :  { %4674 = vmatprep.subr.bf16.mxu0 %v5284_v6  ;;  %v3158_v31 = vld [vmem:[%s6793_s2 + $0x228] sm:$0xff]  ;;  %v4693_v34 = vpack.c.bf16 %v3112_v29, %v3111_v27  ;;  %v3113_v35 = vld [vmem:[%s6793_s2 + $0xc0] sm:$0xff]  ;;  %v3159_v38 = vld [vmem:[%s6793_s2 + $0x230] sm:$0xff] }
  0x1f   :  { %4724 = vmatpush3.bf16.msra.mxu1 %v4723_v1  ;;  %v4762_v36 = vpack.c.bf16 %v3158_v31, %v3157_v30  ;;  %v3114_v37 = vld [vmem:[%s6793_s2 + $0xc8] sm:$0xff]  ;;  %v3160_v39 = vld [vmem:[%s6793_s2 + $0x238] sm:$0xff]  ;;  %v3115_v43 = vld [vmem:[%s6793_s2 + $0xd0] sm:$0xff] }
  0x20   :  { %3864 = vmatmul.mubr.msk.f32.gmra.mrb[10].mxu0 %vm67_vm0, %v58_v47  ;;  %4725 = vmatprep.subr.bf16.mxu1 %v5284_v6  ;;  %v4696_v42 = vpack.c.bf16 %v3114_v37, %v3113_v35  ;;  %v4765_v44 = vpack.c.bf16 %v3160_v39, %v3159_v38  ;;  %v3116_v45 = vld [vmem:[%s6793_s2 + $0xd8] sm:$0xff]  ;;  %v3161_v46 = vld [vmem:[%s6793_s2 + $0x240] sm:$0xff]  ;;  %v3162_v47 = vld [vmem:[%s6793_s2 + $0x248] sm:$0xff] }
  0x21   :  { %3866 = vmatprep.mubr.msk.f32.mxu0 %vm67_vm0, %v59_v49  ;;  %4676 = vmatpush3.bf16.msra.mxu0 %v4675_v48  ;;  %v4699_v50 = vpack.c.bf16 %v3116_v45, %v3115_v43  ;;  %v3117_v51 = vld [vmem:[%s6793_s2 + $0xe0] sm:$0xff]  ;;  %v3164_v55 = vld [vmem:[%s6793_s2 + $0x258] sm:$0xff]  ;;  %v3119_v59 = vld [vmem:[%s6793_s2 + $0xf0] sm:$0xff] }
  0x22   :  { %4677 = vmatprep.subr.bf16.mxu0 %v5284_v6  ;;  %v3120_v62 = vld [vmem:[%s6793_s2 + $0xf8] sm:$0xff]  ;;  %v3165_v63 = vld [vmem:[%s6793_s2 + $0x260] sm:$0xff]  ;;  %v3166_v0 = vld [vmem:[%s6793_s2 + $0x268] sm:$0xff] }
  0x23   :  { %4727 = vmatpush3.bf16.msra.mxu1 %v4726_v4  ;;  %v4705_v1 = vpack.c.bf16 %v3120_v62, %v3119_v59  ;;  %v3137_v2 = vld [vmem:[%s6793_s2 + $0x180] sm:$0xff]  ;;  %v4774_v3 = vpack.c.bf16 %v3166_v0, %v3165_v63  ;;  %v3138_v4 = vld [vmem:[%s6793_s2 + $0x188] sm:$0xff]  ;;  %v3167_v5 = vld [vmem:[%s6793_s2 + $0x270] sm:$0xff] }
  0x24   :  { %3867 = vmatmul.mubr.msk.f32.gmra.mrb[12].mxu0 %vm67_vm0, %v60_v52  ;;  %4728 = vmatprep.subr.bf16.mxu1 %v5284_v6  ;;  %v4768_v52 = vpack.c.bf16 %v3162_v47, %v3161_v46  ;;  %v3168_v7 = vld [vmem:[%s6793_s2 + $0x278] sm:$0xff]  ;;  %v3139_v9 = vld [vmem:[%s6793_s2 + $0x190] sm:$0xff]  ;;  %v3185_v12 = vld [vmem:[%s6793_s2 + $0x300] sm:$0xff] }
  0x25   :  { %4679 = vmatpush3.bf16.msra.mxu0 %v4678_v53  ;;  %3869 = vmatprep.mubr.msk.f32.mxu0 %vm67_vm0, %v61_v54  ;;  %v3118_v53 = vld [vmem:[%s6793_s2 + $0xe8] sm:$0xff]  ;;  %v3163_v54 = vld [vmem:[%s6793_s2 + $0x250] sm:$0xff]  ;;  %v4777_v10 = vpack.c.bf16 %v3168_v7, %v3167_v5  ;;  %v3141_v16 = vld [vmem:[%s6793_s2 + $0x1a0] sm:$0xff] }
  0x26   :  { %4680 = vmatprep.subr.bf16.mxu0 %v5284_v6  ;;  %v4771_v60 = vpack.c.bf16 %v3164_v55, %v3163_v54  ;;  %v3186_v14 = vld [vmem:[%s6793_s2 + $0x308] sm:$0xff]  ;;  %v3188_v19 = vld [vmem:[%s6793_s2 + $0x318] sm:$0xff]  ;;  %v3143_v21 = vld [vmem:[%s6793_s2 + $0x1b0] sm:$0xff] }
  0x27   :  { %4730 = vmatpush3.bf16.msra.mxu1 %v4729_v8  ;;  %v4732_v8 = vpack.c.bf16 %v3138_v4, %v3137_v2  ;;  %v3144_v24 = vld [vmem:[%s6793_s2 + $0x1b8] sm:$0xff]  ;;  %v3146_v30 = vld [vmem:[%s6793_s2 + $0x1c8] sm:$0xff]  ;;  %v3191_v31 = vld [vmem:[%s6793_s2 + $0x330] sm:$0xff] }
  0x28   :  { %3870 = vmatmul.mubr.msk.f32.gmra.mrb[14].mxu0 %vm67_vm0, %v62_v57  ;;  %4755 = vmatprep.subr.bf16.mxu1 %v5284_v6  ;;  %v4741_v27 = vpack.c.bf16 %v3144_v24, %v3143_v21  ;;  %v3147_v35 = vld [vmem:[%s6793_s2 + $0x1d0] sm:$0xff]  ;;  %v3148_v38 = vld [vmem:[%s6793_s2 + $0x1d8] sm:$0xff]  ;;  %v3193_v39 = vld [vmem:[%s6793_s2 + $0x340] sm:$0xff] }
  0x29   :  { %4682 = vmatpush3.bf16.msra.mxu0 %v4681_v58  ;;  %3904 = vmatprep.mubr.msk.f32.mxu0 %vm5285_vm1, %v5286_v61  ;;  %v4702_v58 = vpack.c.bf16 %v3118_v53, %v3117_v51  ;;  %v3149_v45 = vld [vmem:[%s6793_s2 + $0x1e0] sm:$0xff]  ;;  %v3150_v47 = vld [vmem:[%s6793_s2 + $0x1e8] sm:$0xff]  ;;  %v3196_v51 = vld [vmem:[%s6793_s2 + $0x358] sm:$0xff] }
  0x2a   :  { %4683 = vmatprep.subr.bf16.mxu0 %v5284_v6  ;;  %v3151_v53 = vld [vmem:[%s6793_s2 + $0x1f0] sm:$0xff]  ;;  %v3152_v55 = vld [vmem:[%s6793_s2 + $0x1f8] sm:$0xff]  ;;  %v3198_v59 = vld [vmem:[%s6793_s2 + $0x368] sm:$0xff] }
  0x2b   :  { %v3169_v62 = vld [vmem:[%s6793_s2 + $0x280] sm:$0xff]  ;;  %v3170_v0 = vld [vmem:[%s6793_s2 + $0x288] sm:$0xff]  ;;  %v3200_v2 = vld [vmem:[%s6793_s2 + $0x378] sm:$0xff] }
  0x2c   :  { %v3171_v4 = vld [vmem:[%s6793_s2 + $0x290] sm:$0xff]  ;;  %v3172_v7 = vld [vmem:[%s6793_s2 + $0x298] sm:$0xff]  ;;  %v3177_v21 = vld [vmem:[%s6793_s2 + $0x2c0] sm:$0xff] }
  0x2d   :  { %v3178_v24 = vld [vmem:[%s6793_s2 + $0x2c8] sm:$0xff] }
  0xdf   :  { %v5571_v13 = vpop.f32.mrb[0].mxu0 }
  0xe0   :  { %v182_v17 = vpop.f32.mrb[1].mxu0 }
  0xe1   :  { %3905 = vmatmul.mubr.f32.vlgmr.msra.gmra.mrb[16].mxu0 %v182_v17  ;;  %v4804_v17 = vpack.c.bf16 %v3186_v14, %v3185_v12  ;;  %v3174_v14 = vld [vmem:[%s6793_s2 + $0x2a8] sm:$0xff] }
  0xe2   :  { %4685 = vmatpush3.bf16.msra.mxu0 %v4684_v11  ;;  %3939 = vmatprep.mubr.msk.f32.mxu0 %vm5285_vm1, %v5286_v61  ;;  %v3140_v11 = vld [vmem:[%s6793_s2 + $0x198] sm:$0xff] }
  0xe3   :  { %4686 = vmatprep.subr.bf16.mxu0 %v5284_v6  ;;  %v5591_v22 = vpop.f32.mrb[2].mxu0  ;;  %v4735_v15 = vpack.c.bf16 %v3140_v11, %v3139_v9  ;;  %v3218_v9 = vld [vmem:[%s6793_s2 + $0x408] sm:$0xff]  ;;  %v3173_v11 = vld [vmem:[%s6793_s2 + $0x2a0] sm:$0xff] }
  0xe4   :  { %v192_v25 = vpop.f32.mrb[3].mxu0 }
  0xe5   :  { %3975 = vmatmul.mubr.f32.vlgmr.msra.gmra.mrb[0].mxu1 %v192_v25  ;;  %v3189_v25 = vld [vmem:[%s6793_s2 + $0x320] sm:$0xff] }
  0xe6   :  { %4688 = vmatpush3.bf16.msra.mxu0 %v4687_v18  ;;  %4757 = vmatpush3.bf16.msra.mxu1 %v4756_v20  ;;  %v3142_v18 = vld [vmem:[%s6793_s2 + $0x1a8] sm:$0xff] }
  0xe7   :  { %4689 = vmatprep.subr.bf16.mxu0 %v5284_v6  ;;  %4758 = vmatprep.subr.bf16.mxu1 %v5284_v6  ;;  %v5613_v32 = vpop.f32.mrb[4].mxu0  ;;  %v4738_v20 = vpack.c.bf16 %v3142_v18, %v3141_v16  ;;  %v4786_v16 = vpack.c.bf16 %v3174_v14, %v3173_v11 }
  0xe8   :  { %v5615_v33 = vpop.f32.mrb[5].mxu0  ;;  %4044 = vmatprep.mubr.msk.f32.mxu1 %vm5285_vm1, %v5286_v61 }
  0xea   :  { %4691 = vmatpush3.bf16.msra.mxu0 %v4690_v26  ;;  %4760 = vmatpush3.bf16.msra.mxu1 %v4759_v28  ;;  %v3190_v26 = vld [vmem:[%s6793_s2 + $0x328] sm:$0xff]  ;;  %v3145_v28 = vld [vmem:[%s6793_s2 + $0x1c0] sm:$0xff] }
  0xeb   :  { %4692 = vmatprep.subr.bf16.mxu0 %v5284_v6  ;;  %4761 = vmatprep.subr.bf16.mxu1 %v5284_v6  ;;  %v5633_v40 = vpop.f32.mrb[6].mxu0  ;;  %v4810_v29 = vpack.c.bf16 %v3190_v26, %v3189_v25  ;;  %v3223_v25 = vld [vmem:[%s6793_s2 + $0x430] sm:$0xff]  ;;  %v3224_v26 = vld [vmem:[%s6793_s2 + $0x438] sm:$0xff] }
  0xec   :  { %v5635_v41 = vpop.f32.mrb[7].mxu0 }
  0xee   :  { %4694 = vmatpush3.bf16.msra.mxu0 %v4693_v34  ;;  %4763 = vmatpush3.bf16.msra.mxu1 %v4762_v36  ;;  %v4744_v34 = vpack.c.bf16 %v3146_v30, %v3145_v28  ;;  %v3179_v28 = vld [vmem:[%s6793_s2 + $0x2d0] sm:$0xff] }
  0xef   :  { %4695 = vmatprep.subr.bf16.mxu0 %v5284_v6  ;;  %4764 = vmatprep.subr.bf16.mxu1 %v5284_v6  ;;  %v5651_v48 = vpop.f32.mrb[8].mxu0 }
  0xf0   :  { %v5653_v49 = vpop.f32.mrb[9].mxu0 }
  0xf2   :  { %4697 = vmatpush3.bf16.msra.mxu0 %v4696_v42  ;;  %4766 = vmatpush3.bf16.msra.mxu1 %v4765_v44  ;;  %v3194_v42 = vld [vmem:[%s6793_s2 + $0x348] sm:$0xff]  ;;  %v4747_v44 = vpack.c.bf16 %v3148_v38, %v3147_v35  ;;  %v3181_v38 = vld [vmem:[%s6793_s2 + $0x2e0] sm:$0xff] }
  0xf3   :  { %4698 = vmatprep.subr.bf16.mxu0 %v5284_v6  ;;  %4767 = vmatprep.subr.bf16.mxu1 %v5284_v6  ;;  %v5669_v56 = vpop.f32.mrb[10].mxu0  ;;  %v4816_v46 = vpack.c.bf16 %v3194_v42, %v3193_v39  ;;  %v3182_v42 = vld [vmem:[%s6793_s2 + $0x2e8] sm:$0xff] }
  0xf4   :  { %v5671_v57 = vpop.f32.mrb[11].mxu0 }
  0xf6   :  { %4700 = vmatpush3.bf16.msra.mxu0 %v4699_v50  ;;  %4769 = vmatpush3.bf16.msra.mxu1 %v4768_v52  ;;  %v3195_v50 = vld [vmem:[%s6793_s2 + $0x350] sm:$0xff]  ;;  %v4750_v52 = vpack.c.bf16 %v3150_v47, %v3149_v45  ;;  %v3228_v45 = vld [vmem:[%s6793_s2 + $0x458] sm:$0xff] }
  0xf7   :  { %4701 = vmatprep.subr.bf16.mxu0 %v5284_v6  ;;  %4770 = vmatprep.subr.bf16.mxu1 %v5284_v6  ;;  %v5766_v37 = vpop.f32.mrb[12].mxu0  ;;  %v4819_v54 = vpack.c.bf16 %v3196_v51, %v3195_v50  ;;  %v3183_v47 = vld [vmem:[%s6793_s2 + $0x2f0] sm:$0xff]  ;;  %v3184_v51 = vld [vmem:[%s6793_s2 + $0x2f8] sm:$0xff] }
  0xf8   :  { %v5779_v43 = vpop.f32.mrb[13].mxu0 }
  0xfa   :  { %4703 = vmatpush3.bf16.msra.mxu0 %v4702_v58  ;;  %4772 = vmatpush3.bf16.msra.mxu1 %v4771_v60  ;;  %v3197_v58 = vld [vmem:[%s6793_s2 + $0x360] sm:$0xff]  ;;  %v4753_v60 = vpack.c.bf16 %v3152_v55, %v3151_v53  ;;  %v3230_v53 = vld [vmem:[%s6793_s2 + $0x468] sm:$0xff] }
  0xfb   :  { %4704 = vmatprep.subr.bf16.mxu0 %v5284_v6  ;;  %4773 = vmatprep.subr.bf16.mxu1 %v5284_v6  ;;  %v4822_v63 = vpack.c.bf16 %v3198_v59, %v3197_v58  ;;  %v5888_v30 = vpop.f32.mrb[14].mxu0  ;;  %v3201_v55 = vld [vmem:[%s6793_s2 + $0x380] sm:$0xff]  ;;  %v3202_v59 = vld [vmem:[%s6793_s2 + $0x388] sm:$0xff] }
  0xfc   :  { %v5901_v35 = vpop.f32.mrb[15].mxu0 }
  0xfe   :  { %4706 = vmatpush3.bf16.msra.mxu0 %v4705_v1  ;;  %4775 = vmatpush3.bf16.msra.mxu1 %v4774_v3  ;;  %v3199_v1 = vld [vmem:[%s6793_s2 + $0x370] sm:$0xff]  ;;  %v4780_v3 = vpack.c.bf16 %v3170_v0, %v3169_v62  ;;  %v3232_v62 = vld [vmem:[%s6793_s2 + $0x478] sm:$0xff] }
  0xff   :  { %4731 = vmatprep.subr.bf16.mxu0 %v5284_v6  ;;  %4776 = vmatprep.subr.bf16.mxu1 %v5284_v6  ;;  %v4825_v5 = vpack.c.bf16 %v3200_v2, %v3199_v1  ;;  %v3203_v0 = vld [vmem:[%s6793_s2 + $0x390] sm:$0xff]  ;;  %v3204_v2 = vld [vmem:[%s6793_s2 + $0x398] sm:$0xff] }
 0x101   :  { %3940 = vmatmul.mubr.f32.vlgmr.msra.gmra.mrb[18].mxu0 %v5571_v13  ;;  %v3187_v13 = vld [vmem:[%s6793_s2 + $0x310] sm:$0xff] }
 0x102   :  { %4733 = vmatpush3.bf16.msra.mxu0 %v4732_v8  ;;  %4778 = vmatpush3.bf16.msra.mxu1 %v4777_v10  ;;  %v4807_v23 = vpack.c.bf16 %v3188_v19, %v3187_v13  ;;  %v3217_v8 = vld [vmem:[%s6793_s2 + $0x400] sm:$0xff]  ;;  %v4783_v10 = vpack.c.bf16 %v3172_v7, %v3171_v4  ;;  %v3176_v13 = vld [vmem:[%s6793_s2 + $0x2b8] sm:$0xff]  ;;  %v3222_v19 = vld [vmem:[%s6793_s2 + $0x428] sm:$0xff] }
 0x103   :  { %4734 = vmatprep.subr.bf16.mxu0 %v5284_v6  ;;  %4803 = vmatprep.subr.bf16.mxu1 %v5284_v6  ;;  %v4852_v12 = vpack.c.bf16 %v3218_v9, %v3217_v8  ;;  %v3250_v4 = vld [vmem:[%s6793_s2 + $0x508] sm:$0xff]  ;;  %v3205_v7 = vld [vmem:[%s6793_s2 + $0x3a0] sm:$0xff] }
 0x104   :  { %4009 = vmatprep.mubr.msk.f32.mxu0 %vm5285_vm1, %v5286_v61  ;;  %v3206_v9 = vld [vmem:[%s6793_s2 + $0x3a8] sm:$0xff] }
 0x105   :  { %4045 = vmatmul.mubr.f32.vlgmr.msra.gmra.mrb[2].mxu1 %v5615_v33  ;;  %v3192_v33 = vld [vmem:[%s6793_s2 + $0x338] sm:$0xff]  ;;  %v4834_v11 = vpack.c.bf16 %v3206_v9, %v3205_v7  ;;  %v3286_v9 = vld [vmem:[%s6793_s2 + $0x628] sm:$0xff] }
 0x106   :  { %4736 = vmatpush3.bf16.msra.mxu0 %v4735_v15  ;;  %4805 = vmatpush3.bf16.msra.mxu1 %v4804_v17  ;;  %v4813_v36 = vpack.c.bf16 %v3192_v33, %v3191_v31  ;;  %v3220_v15 = vld [vmem:[%s6793_s2 + $0x418] sm:$0xff]  ;;  %v3175_v17 = vld [vmem:[%s6793_s2 + $0x2b0] sm:$0xff]  ;;  %v3225_v33 = vld [vmem:[%s6793_s2 + $0x440] sm:$0xff] }
 0x107   :  { %4737 = vmatprep.subr.bf16.mxu0 %v5284_v6  ;;  %4806 = vmatprep.subr.bf16.mxu1 %v5284_v6  ;;  %v3180_v31 = vld [vmem:[%s6793_s2 + $0x2d8] sm:$0xff] }
 0x108   :  { %4114 = vmatprep.mubr.msk.f32.mxu1 %vm5285_vm1, %v5286_v61 }
 0x10a   :  { %4739 = vmatpush3.bf16.msra.mxu0 %v4738_v20  ;;  %4808 = vmatpush3.bf16.msra.mxu1 %v4807_v23  ;;  %v4789_v20 = vpack.c.bf16 %v3176_v13, %v3175_v17  ;;  %v3209_v17 = vld [vmem:[%s6793_s2 + $0x3c0] sm:$0xff]  ;;  %v3210_v13 = vld [vmem:[%s6793_s2 + $0x3c8] sm:$0xff] }
 0x10b   :  { %4740 = vmatprep.subr.bf16.mxu0 %v5284_v6  ;;  %4809 = vmatprep.subr.bf16.mxu1 %v5284_v6 }
 0x10e   :  { %4742 = vmatpush3.bf16.msra.mxu0 %v4741_v27  ;;  %4811 = vmatpush3.bf16.msra.mxu1 %v4810_v29  ;;  %v4792_v27 = vpack.c.bf16 %v3178_v24, %v3177_v21  ;;  %v4861_v29 = vpack.c.bf16 %v3224_v26, %v3223_v25  ;;  %v3211_v21 = vld [vmem:[%s6793_s2 + $0x3d0] sm:$0xff]  ;;  %v3212_v24 = vld [vmem:[%s6793_s2 + $0x3d8] sm:$0xff]  ;;  %v3257_v25 = vld [vmem:[%s6793_s2 + $0x540] sm:$0xff] }
 0x10f   :  { %4743 = vmatprep.subr.bf16.mxu0 %v5284_v6  ;;  %4812 = vmatprep.subr.bf16.mxu1 %v5284_v6  ;;  %v3258_v26 = vld [vmem:[%s6793_s2 + $0x548] sm:$0xff] }
 0x112   :  { %4745 = vmatpush3.bf16.msra.mxu0 %v4744_v34  ;;  %4814 = vmatpush3.bf16.msra.mxu1 %v4813_v36  ;;  %v3226_v34 = vld [vmem:[%s6793_s2 + $0x448] sm:$0xff]  ;;  %v4795_v36 = vpack.c.bf16 %v3180_v31, %v3179_v28  ;;  %v3213_v28 = vld [vmem:[%s6793_s2 + $0x3e0] sm:$0xff] }
 0x113   :  { %4746 = vmatprep.subr.bf16.mxu0 %v5284_v6  ;;  %4815 = vmatprep.subr.bf16.mxu1 %v5284_v6  ;;  %v4864_v39 = vpack.c.bf16 %v3226_v34, %v3225_v33  ;;  %v3214_v31 = vld [vmem:[%s6793_s2 + $0x3e8] sm:$0xff]  ;;  %v3259_v33 = vld [vmem:[%s6793_s2 + $0x550] sm:$0xff]  ;;  %v3260_v34 = vld [vmem:[%s6793_s2 + $0x558] sm:$0xff] }
 0x116   :  { %4748 = vmatpush3.bf16.msra.mxu0 %v4747_v44  ;;  %4817 = vmatpush3.bf16.msra.mxu1 %v4816_v46  ;;  %v3227_v44 = vld [vmem:[%s6793_s2 + $0x450] sm:$0xff]  ;;  %v4798_v46 = vpack.c.bf16 %v3182_v42, %v3181_v38  ;;  %v3216_v42 = vld [vmem:[%s6793_s2 + $0x3f8] sm:$0xff] }
 0x117   :  { %4749 = vmatprep.subr.bf16.mxu0 %v5284_v6  ;;  %4818 = vmatprep.subr.bf16.mxu1 %v5284_v6  ;;  %v4867_v50 = vpack.c.bf16 %v3228_v45, %v3227_v44  ;;  %v3215_v38 = vld [vmem:[%s6793_s2 + $0x3f0] sm:$0xff]  ;;  %v3261_v44 = vld [vmem:[%s6793_s2 + $0x560] sm:$0xff]  ;;  %v3262_v45 = vld [vmem:[%s6793_s2 + $0x568] sm:$0xff] }
 0x11a   :  { %4751 = vmatpush3.bf16.msra.mxu0 %v4750_v52  ;;  %4820 = vmatpush3.bf16.msra.mxu1 %v4819_v54  ;;  %v3229_v52 = vld [vmem:[%s6793_s2 + $0x460] sm:$0xff]  ;;  %v4801_v54 = vpack.c.bf16 %v3184_v51, %v3183_v47  ;;  %v3234_v51 = vld [vmem:[%s6793_s2 + $0x488] sm:$0xff] }
 0x11b   :  { %4752 = vmatprep.subr.bf16.mxu0 %v5284_v6  ;;  %4821 = vmatprep.subr.bf16.mxu1 %v5284_v6  ;;  %v4870_v58 = vpack.c.bf16 %v3230_v53, %v3229_v52  ;;  %v3233_v47 = vld [vmem:[%s6793_s2 + $0x480] sm:$0xff]  ;;  %v3263_v52 = vld [vmem:[%s6793_s2 + $0x570] sm:$0xff]  ;;  %v3264_v53 = vld [vmem:[%s6793_s2 + $0x578] sm:$0xff] }
 0x11e   :  { %4754 = vmatpush3.bf16.msra.mxu0 %v4753_v60  ;;  %4823 = vmatpush3.bf16.msra.mxu1 %v4822_v63  ;;  %v3231_v60 = vld [vmem:[%s6793_s2 + $0x470] sm:$0xff]  ;;  %v4828_v63 = vpack.c.bf16 %v3202_v59, %v3201_v55  ;;  %v3236_v59 = vld [vmem:[%s6793_s2 + $0x498] sm:$0xff] }
 0x11f   :  { %4779 = vmatprep.subr.bf16.mxu0 %v5284_v6  ;;  %4824 = vmatprep.subr.bf16.mxu1 %v5284_v6  ;;  %v4873_v1 = vpack.c.bf16 %v3232_v62, %v3231_v60  ;;  %v3235_v55 = vld [vmem:[%s6793_s2 + $0x490] sm:$0xff]  ;;  %v3281_v60 = vld [vmem:[%s6793_s2 + $0x600] sm:$0xff]  ;;  %v3282_v62 = vld [vmem:[%s6793_s2 + $0x608] sm:$0xff] }
 0x121   :  { %4010 = vmatmul.mubr.f32.vlgmr.msra.gmra.mrb[20].mxu0 %v5591_v22  ;;  %v3219_v22 = vld [vmem:[%s6793_s2 + $0x410] sm:$0xff] }
 0x122   :  { %4781 = vmatpush3.bf16.msra.mxu0 %v4780_v3  ;;  %4826 = vmatpush3.bf16.msra.mxu1 %v4825_v5  ;;  %v4855_v18 = vpack.c.bf16 %v3220_v15, %v3219_v22  ;;  %v3249_v3 = vld [vmem:[%s6793_s2 + $0x500] sm:$0xff]  ;;  %v4831_v5 = vpack.c.bf16 %v3204_v2, %v3203_v0  ;;  %v3208_v22 = vld [vmem:[%s6793_s2 + $0x3b8] sm:$0xff]  ;;  %v3254_v15 = vld [vmem:[%s6793_s2 + $0x528] sm:$0xff] }
 0x123   :  { %4782 = vmatprep.subr.bf16.mxu0 %v5284_v6  ;;  %4851 = vmatprep.subr.bf16.mxu1 %v5284_v6  ;;  %v4900_v8 = vpack.c.bf16 %v3250_v4, %v3249_v3  ;;  %v3237_v0 = vld [vmem:[%s6793_s2 + $0x4a0] sm:$0xff]  ;;  %v3238_v2 = vld [vmem:[%s6793_s2 + $0x4a8] sm:$0xff]  ;;  %v3284_v3 = vld [vmem:[%s6793_s2 + $0x618] sm:$0xff] }
 0x124   :  { %4079 = vmatprep.mubr.msk.f32.mxu0 %vm5285_vm1, %v5286_v61  ;;  %v4882_v4 = vpack.c.bf16 %v3238_v2, %v3237_v0  ;;  %v3318_v0 = vld [vmem:[%s6793_s2 + $0x728] sm:$0xff]  ;;  %v3273_v2 = vld [vmem:[%s6793_s2 + $0x5c0] sm:$0xff] }
 0x125   :  { %4115 = vmatmul.mubr.f32.vlgmr.msra.gmra.mrb[4].mxu1 %v5635_v41  ;;  %v3221_v41 = vld [vmem:[%s6793_s2 + $0x420] sm:$0xff] }
 0x126   :  { %4784 = vmatpush3.bf16.msra.mxu0 %v4783_v10  ;;  %4853 = vmatpush3.bf16.msra.mxu1 %v4852_v12  ;;  %v4858_v23 = vpack.c.bf16 %v3222_v19, %v3221_v41  ;;  %v3252_v10 = vld [vmem:[%s6793_s2 + $0x518] sm:$0xff]  ;;  %v3207_v12 = vld [vmem:[%s6793_s2 + $0x3b0] sm:$0xff] }
 0x127   :  { %4785 = vmatprep.subr.bf16.mxu0 %v5284_v6  ;;  %4854 = vmatprep.subr.bf16.mxu1 %v5284_v6  ;;  %v3255_v41 = vld [vmem:[%s6793_s2 + $0x530] sm:$0xff]  ;;  %v3256_v19 = vld [vmem:[%s6793_s2 + $0x538] sm:$0xff] }
 0x128   :  { %4184 = vmatprep.mubr.msk.f32.mxu1 %vm5285_vm1, %v5286_v61 }
 0x12a   :  { %4787 = vmatpush3.bf16.msra.mxu0 %v4786_v16  ;;  %4856 = vmatpush3.bf16.msra.mxu1 %v4855_v18  ;;  %v4837_v16 = vpack.c.bf16 %v3208_v22, %v3207_v12  ;;  %v3242_v12 = vld [vmem:[%s6793_s2 + $0x4c8] sm:$0xff]  ;;  %v3288_v22 = vld [vmem:[%s6793_s2 + $0x638] sm:$0xff] }
 0x12b   :  { %4788 = vmatprep.subr.bf16.mxu0 %v5284_v6  ;;  %4857 = vmatprep.subr.bf16.mxu1 %v5284_v6 }
 0x12e   :  { %4790 = vmatpush3.bf16.msra.mxu0 %v4789_v20  ;;  %4859 = vmatpush3.bf16.msra.mxu1 %v4858_v23  ;;  %v4840_v20 = vpack.c.bf16 %v3210_v13, %v3209_v17  ;;  %v4909_v23 = vpack.c.bf16 %v3256_v19, %v3255_v41  ;;  %v3244_v17 = vld [vmem:[%s6793_s2 + $0x4d8] sm:$0xff]  ;;  %v3290_v13 = vld [vmem:[%s6793_s2 + $0x648] sm:$0xff]  ;;  %v3245_v19 = vld [vmem:[%s6793_s2 + $0x4e0] sm:$0xff] }
 0x12f   :  { %4791 = vmatprep.subr.bf16.mxu0 %v5284_v6  ;;  %4860 = vmatprep.subr.bf16.mxu1 %v5284_v6 }
 0x132   :  { %4793 = vmatpush3.bf16.msra.mxu0 %v4792_v27  ;;  %4862 = vmatpush3.bf16.msra.mxu1 %v4861_v29  ;;  %v4843_v27 = vpack.c.bf16 %v3212_v24, %v3211_v21  ;;  %v4912_v29 = vpack.c.bf16 %v3258_v26, %v3257_v25  ;;  %v3246_v21 = vld [vmem:[%s6793_s2 + $0x4e8] sm:$0xff]  ;;  %v3292_v24 = vld [vmem:[%s6793_s2 + $0x658] sm:$0xff]  ;;  %v3247_v26 = vld [vmem:[%s6793_s2 + $0x4f0] sm:$0xff] }
 0x133   :  { %4794 = vmatprep.subr.bf16.mxu0 %v5284_v6  ;;  %4863 = vmatprep.subr.bf16.mxu1 %v5284_v6  ;;  %v4894_v25 = vpack.c.bf16 %v3246_v21, %v3245_v19  ;;  %v3326_v19 = vld [vmem:[%s6793_s2 + $0x768] sm:$0xff]  ;;  %v3297_v21 = vld [vmem:[%s6793_s2 + $0x680] sm:$0xff] }
 0x136   :  { %4796 = vmatpush3.bf16.msra.mxu0 %v4795_v36  ;;  %4865 = vmatpush3.bf16.msra.mxu1 %v4864_v39  ;;  %v4846_v36 = vpack.c.bf16 %v3214_v31, %v3213_v28  ;;  %v4915_v39 = vpack.c.bf16 %v3260_v34, %v3259_v33  ;;  %v3248_v28 = vld [vmem:[%s6793_s2 + $0x4f8] sm:$0xff]  ;;  %v3294_v31 = vld [vmem:[%s6793_s2 + $0x668] sm:$0xff]  ;;  %v3265_v34 = vld [vmem:[%s6793_s2 + $0x580] sm:$0xff] }
 0x137   :  { %4797 = vmatprep.subr.bf16.mxu0 %v5284_v6  ;;  %4866 = vmatprep.subr.bf16.mxu1 %v5284_v6  ;;  %v4897_v33 = vpack.c.bf16 %v3248_v28, %v3247_v26  ;;  %v3328_v26 = vld [vmem:[%s6793_s2 + $0x778] sm:$0xff] }
 0x13a   :  { %4799 = vmatpush3.bf16.msra.mxu0 %v4798_v46  ;;  %4868 = vmatpush3.bf16.msra.mxu1 %v4867_v50  ;;  %v4849_v46 = vpack.c.bf16 %v3216_v42, %v3215_v38  ;;  %v4918_v50 = vpack.c.bf16 %v3262_v45, %v3261_v44  ;;  %v3266_v38 = vld [vmem:[%s6793_s2 + $0x588] sm:$0xff]  ;;  %v3296_v42 = vld [vmem:[%s6793_s2 + $0x678] sm:$0xff]  ;;  %v3267_v45 = vld [vmem:[%s6793_s2 + $0x590] sm:$0xff] }
 0x13b   :  { %4800 = vmatprep.subr.bf16.mxu0 %v5284_v6  ;;  %4869 = vmatprep.subr.bf16.mxu1 %v5284_v6  ;;  %v4924_v44 = vpack.c.bf16 %v3266_v38, %v3265_v34  ;;  %v3301_v34 = vld [vmem:[%s6793_s2 + $0x6a0] sm:$0xff]  ;;  %v3303_v38 = vld [vmem:[%s6793_s2 + $0x6b0] sm:$0xff] }
 0x13e   :  { %4802 = vmatpush3.bf16.msra.mxu0 %v4801_v54  ;;  %4871 = vmatpush3.bf16.msra.mxu1 %v4870_v58  ;;  %v4876_v54 = vpack.c.bf16 %v3234_v51, %v3233_v47  ;;  %v4921_v58 = vpack.c.bf16 %v3264_v53, %v3263_v52  ;;  %v3268_v47 = vld [vmem:[%s6793_s2 + $0x598] sm:$0xff]  ;;  %v3314_v51 = vld [vmem:[%s6793_s2 + $0x708] sm:$0xff]  ;;  %v3269_v53 = vld [vmem:[%s6793_s2 + $0x5a0] sm:$0xff] }
 0x13f   :  { %4827 = vmatprep.subr.bf16.mxu0 %v5284_v6  ;;  %4872 = vmatprep.subr.bf16.mxu1 %v5284_v6  ;;  %v4927_v52 = vpack.c.bf16 %v3268_v47, %v3267_v45  ;;  %v3308_v47 = vld [vmem:[%s6793_s2 + $0x6d8] sm:$0xff] }
 0x141   :  { %4080 = vmatmul.mubr.f32.vlgmr.msra.gmra.mrb[22].mxu0 %v5613_v32  ;;  %v3251_v32 = vld [vmem:[%s6793_s2 + $0x510] sm:$0xff] }
 0x142   :  { %4829 = vmatpush3.bf16.msra.mxu0 %v4828_v63  ;;  %4874 = vmatpush3.bf16.msra.mxu1 %v4873_v1  ;;  %v4903_v14 = vpack.c.bf16 %v3252_v10, %v3251_v32  ;;  %v4879_v63 = vpack.c.bf16 %v3236_v59, %v3235_v55  ;;  %v4948_v1 = vpack.c.bf16 %v3282_v62, %v3281_v60  ;;  %v3241_v10 = vld [vmem:[%s6793_s2 + $0x4c0] sm:$0xff]  ;;  %v3270_v55 = vld [vmem:[%s6793_s2 + $0x5a8] sm:$0xff]  ;;  %v3271_v60 = vld [vmem:[%s6793_s2 + $0x5b0] sm:$0xff] }
 0x143   :  { %4830 = vmatprep.subr.bf16.mxu0 %v5284_v6  ;;  %4899 = vmatprep.subr.bf16.mxu1 %v5284_v6  ;;  %v4930_v59 = vpack.c.bf16 %v3270_v55, %v3269_v53 }
 0x144   :  { %4149 = vmatprep.mubr.msk.f32.mxu0 %vm5285_vm1, %v5286_v61 }
 0x145   :  { %4185 = vmatmul.mubr.f32.vlgmr.msra.gmra.mrb[6].mxu1 %v5653_v49  ;;  %v3253_v49 = vld [vmem:[%s6793_s2 + $0x520] sm:$0xff] }
 0x146   :  { %4832 = vmatpush3.bf16.msra.mxu0 %v4831_v5  ;;  %4901 = vmatpush3.bf16.msra.mxu1 %v4900_v8  ;;  %v4906_v18 = vpack.c.bf16 %v3254_v15, %v3253_v49  ;;  %v3239_v5 = vld [vmem:[%s6793_s2 + $0x4b0] sm:$0xff]  ;;  %v3240_v8 = vld [vmem:[%s6793_s2 + $0x4b8] sm:$0xff]  ;;  %v4888_v49 = vpack.c.bf16 %v3242_v12, %v3241_v10  ;;  %v3322_v10 = vld [vmem:[%s6793_s2 + $0x748] sm:$0xff] }
 0x147   :  { %4833 = vmatprep.subr.bf16.mxu0 %v5284_v6  ;;  %4902 = vmatprep.subr.bf16.mxu1 %v5284_v6  ;;  %v4885_v32 = vpack.c.bf16 %v3240_v8, %v3239_v5  ;;  %v3243_v15 = vld [vmem:[%s6793_s2 + $0x4d0] sm:$0xff]  ;;  %v3320_v5 = vld [vmem:[%s6793_s2 + $0x738] sm:$0xff]  ;;  %v3277_v12 = vld [vmem:[%s6793_s2 + $0x5e0] sm:$0xff] }
 0x148   :  { %4254 = vmatprep.mubr.msk.f32.mxu1 %vm5285_vm1, %v5286_v61  ;;  %v4891_v41 = vpack.c.bf16 %v3244_v17, %v3243_v15  ;;  %v3275_v8 = vld [vmem:[%s6793_s2 + $0x5d0] sm:$0xff]  ;;  %v3324_v15 = vld [vmem:[%s6793_s2 + $0x758] sm:$0xff] }
 0x149   :  { %v3279_v17 = vld [vmem:[%s6793_s2 + $0x5f0] sm:$0xff] }
 0x14a   :  { %4835 = vmatpush3.bf16.msra.mxu0 %v4834_v11  ;;  %4904 = vmatpush3.bf16.msra.mxu1 %v4903_v14  ;;  %v3287_v14 = vld [vmem:[%s6793_s2 + $0x630] sm:$0xff] }
 0x14b   :  { %4836 = vmatprep.subr.bf16.mxu0 %v5284_v6  ;;  %4905 = vmatprep.subr.bf16.mxu1 %v5284_v6 }
 0x14e   :  { %4838 = vmatpush3.bf16.msra.mxu0 %v4837_v16  ;;  %4907 = vmatpush3.bf16.msra.mxu1 %v4906_v18  ;;  %v4957_v16 = vpack.c.bf16 %v3288_v22, %v3287_v14  ;;  %v3289_v18 = vld [vmem:[%s6793_s2 + $0x640] sm:$0xff]  ;;  %v3278_v22 = vld [vmem:[%s6793_s2 + $0x5e8] sm:$0xff] }
 0x14f   :  { %4839 = vmatprep.subr.bf16.mxu0 %v5284_v6  ;;  %4908 = vmatprep.subr.bf16.mxu1 %v5284_v6 }
 0x152   :  { %4841 = vmatpush3.bf16.msra.mxu0 %v4840_v20  ;;  %4910 = vmatpush3.bf16.msra.mxu1 %v4909_v23  ;;  %v4960_v20 = vpack.c.bf16 %v3290_v13, %v3289_v18  ;;  %v3291_v23 = vld [vmem:[%s6793_s2 + $0x650] sm:$0xff]  ;;  %v3280_v13 = vld [vmem:[%s6793_s2 + $0x5f8] sm:$0xff] }
 0x153   :  { %4842 = vmatprep.subr.bf16.mxu0 %v5284_v6  ;;  %4911 = vmatprep.subr.bf16.mxu1 %v5284_v6 }
 0x156   :  { %4844 = vmatpush3.bf16.msra.mxu0 %v4843_v27  ;;  %4913 = vmatpush3.bf16.msra.mxu1 %v4912_v29  ;;  %v4963_v27 = vpack.c.bf16 %v3292_v24, %v3291_v23  ;;  %v3293_v29 = vld [vmem:[%s6793_s2 + $0x660] sm:$0xff]  ;;  %v3298_v24 = vld [vmem:[%s6793_s2 + $0x688] sm:$0xff] }
 0x157   :  { %4845 = vmatprep.subr.bf16.mxu0 %v5284_v6  ;;  %4914 = vmatprep.subr.bf16.mxu1 %v5284_v6 }
 0x15a   :  { %4847 = vmatpush3.bf16.msra.mxu0 %v4846_v36  ;;  %4916 = vmatpush3.bf16.msra.mxu1 %v4915_v39  ;;  %v4966_v36 = vpack.c.bf16 %v3294_v31, %v3293_v29  ;;  %v3295_v39 = vld [vmem:[%s6793_s2 + $0x670] sm:$0xff]  ;;  %v3300_v31 = vld [vmem:[%s6793_s2 + $0x698] sm:$0xff] }
 0x15b   :  { %4848 = vmatprep.subr.bf16.mxu0 %v5284_v6  ;;  %4917 = vmatprep.subr.bf16.mxu1 %v5284_v6  ;;  %v3299_v29 = vld [vmem:[%s6793_s2 + $0x690] sm:$0xff] }
 0x15e   :  { %4850 = vmatpush3.bf16.msra.mxu0 %v4849_v46  ;;  %4919 = vmatpush3.bf16.msra.mxu1 %v4918_v50  ;;  %v4969_v46 = vpack.c.bf16 %v3296_v42, %v3295_v39  ;;  %v3313_v50 = vld [vmem:[%s6793_s2 + $0x700] sm:$0xff]  ;;  %v3304_v39 = vld [vmem:[%s6793_s2 + $0x6b8] sm:$0xff] }
 0x15f   :  { %4875 = vmatprep.subr.bf16.mxu0 %v5284_v6  ;;  %4920 = vmatprep.subr.bf16.mxu1 %v5284_v6  ;;  %v4981_v42 = vpack.c.bf16 %v3304_v39, %v3303_v38 }
 0x161   :  { %4150 = vmatmul.mubr.f32.vlgmr.msra.gmra.mrb[24].mxu0 %v5633_v40  ;;  %v3283_v40 = vld [vmem:[%s6793_s2 + $0x610] sm:$0xff] }
 0x162   :  { %4877 = vmatpush3.bf16.msra.mxu0 %v4876_v54  ;;  %4922 = vmatpush3.bf16.msra.mxu1 %v4921_v58  ;;  %v4951_v7 = vpack.c.bf16 %v3284_v3, %v3283_v40  ;;  %v4996_v54 = vpack.c.bf16 %v3314_v51, %v3313_v50  ;;  %v3316_v58 = vld [vmem:[%s6793_s2 + $0x718] sm:$0xff]  ;;  %v3274_v3 = vld [vmem:[%s6793_s2 + $0x5c8] sm:$0xff]  ;;  %v3309_v51 = vld [vmem:[%s6793_s2 + $0x6e0] sm:$0xff] }
 0x163   :  { %4878 = vmatprep.subr.bf16.mxu0 %v5284_v6  ;;  %4947 = vmatprep.subr.bf16.mxu1 %v5284_v6 }
 0x164   :  { %4219 = vmatprep.mubr.msk.f32.mxu0 %vm5285_vm1, %v5286_v61 }
 0x165   :  { %4255 = vmatmul.mubr.f32.vlgmr.msra.gmra.mrb[8].mxu1 %v5671_v57  ;;  %v3285_v57 = vld [vmem:[%s6793_s2 + $0x620] sm:$0xff] }
 0x166   :  { %4880 = vmatpush3.bf16.msra.mxu0 %v4879_v63  ;;  %4949 = vmatpush3.bf16.msra.mxu1 %v4948_v1  ;;  %v4954_v11 = vpack.c.bf16 %v3286_v9, %v3285_v57  ;;  %v3272_v63 = vld [vmem:[%s6793_s2 + $0x5b8] sm:$0xff] }
 0x167   :  { %4881 = vmatprep.subr.bf16.mxu0 %v5284_v6  ;;  %4950 = vmatprep.subr.bf16.mxu1 %v5284_v6  ;;  %v4933_v1 = vpack.c.bf16 %v3272_v63, %v3271_v60  ;;  %v3276_v9 = vld [vmem:[%s6793_s2 + $0x5d8] sm:$0xff]  ;;  %v3329_v63 = vld [vmem:[%s6793_s2 + $0x780] sm:$0xff] }
 0x168   :  { %4324 = vmatprep.mubr.msk.f32.mxu1 %vm5285_vm1, %v5286_v61 }
 0x16a   :  { %4883 = vmatpush3.bf16.msra.mxu0 %v4882_v4  ;;  %4952 = vmatpush3.bf16.msra.mxu1 %v4951_v7  ;;  %v3319_v4 = vld [vmem:[%s6793_s2 + $0x730] sm:$0xff]  ;;  %v4936_v7 = vpack.c.bf16 %v3274_v3, %v3273_v2  ;;  %v3332_v2 = vld [vmem:[%s6793_s2 + $0x798] sm:$0xff]  ;;  %v3333_v3 = vld [vmem:[%s6793_s2 + $0x7a0] sm:$0xff] }
 0x16b   :  { %4884 = vmatprep.subr.bf16.mxu0 %v5284_v6  ;;  %4953 = vmatprep.subr.bf16.mxu1 %v5284_v6  ;;  %v5005_v57 = vpack.c.bf16 %v3320_v5, %v3319_v4  ;;  %v3334_v4 = vld [vmem:[%s6793_s2 + $0x7a8] sm:$0xff] }
 0x16c   :  { %v5026_v5 = vpack.c.bf16 %v3334_v4, %v3333_v3  ;;  %v2476_v3 = vld [vmem:[%s6797_s6 + $0x10] sm:$0xff] }
 0x16e   :  { %4886 = vmatpush3.bf16.msra.mxu0 %v4885_v32  ;;  %4955 = vmatpush3.bf16.msra.mxu1 %v4954_v11  ;;  %v3321_v32 = vld [vmem:[%s6793_s2 + $0x740] sm:$0xff]  ;;  %v4939_v11 = vpack.c.bf16 %v3276_v9, %v3275_v8 }
 0x16f   :  { %4887 = vmatprep.subr.bf16.mxu0 %v5284_v6  ;;  %4956 = vmatprep.subr.bf16.mxu1 %v5284_v6  ;;  %v5008_v14 = vpack.c.bf16 %v3322_v10, %v3321_v32  ;;  %v3337_v8 = vld [vmem:[%s6793_s2 + $0x7c0] sm:$0xff]  ;;  %v3339_v32 = vld [vmem:[%s6793_s2 + $0x7d0] sm:$0xff]  ;;  %v3340_v10 = vld [vmem:[%s6793_s2 + $0x7d8] sm:$0xff] }
 0x172   :  { %4889 = vmatpush3.bf16.msra.mxu0 %v4888_v49  ;;  %4958 = vmatpush3.bf16.msra.mxu1 %v4957_v16  ;;  %v3323_v49 = vld [vmem:[%s6793_s2 + $0x750] sm:$0xff]  ;;  %v4942_v16 = vpack.c.bf16 %v3278_v22, %v3277_v12  ;;  %v3341_v12 = vld [vmem:[%s6793_s2 + $0x7e0] sm:$0xff] }
 0x173   :  { %4890 = vmatprep.subr.bf16.mxu0 %v5284_v6  ;;  %4959 = vmatprep.subr.bf16.mxu1 %v5284_v6  ;;  %v5011_v18 = vpack.c.bf16 %v3324_v15, %v3323_v49 }
 0x176   :  { %4892 = vmatpush3.bf16.msra.mxu0 %v4891_v41  ;;  %4961 = vmatpush3.bf16.msra.mxu1 %v4960_v20  ;;  %v3325_v41 = vld [vmem:[%s6793_s2 + $0x760] sm:$0xff]  ;;  %v4945_v20 = vpack.c.bf16 %v3280_v13, %v3279_v17  ;;  %v3344_v17 = vld [vmem:[%s6793_s2 + $0x7f8] sm:$0xff] }
 0x177   :  { %4893 = vmatprep.subr.bf16.mxu0 %v5284_v6  ;;  %4962 = vmatprep.subr.bf16.mxu1 %v5284_v6  ;;  %v5014_v23 = vpack.c.bf16 %v3326_v19, %v3325_v41 }
 0x17a   :  { %4895 = vmatpush3.bf16.msra.mxu0 %v4894_v25  ;;  %4964 = vmatpush3.bf16.msra.mxu1 %v4963_v27  ;;  %v3327_v25 = vld [vmem:[%s6793_s2 + $0x770] sm:$0xff]  ;;  %v4972_v27 = vpack.c.bf16 %v3298_v24, %v3297_v21 }
 0x17b   :  { %4896 = vmatprep.subr.bf16.mxu0 %v5284_v6  ;;  %4965 = vmatprep.subr.bf16.mxu1 %v5284_v6  ;;  %v5017_v28 = vpack.c.bf16 %v3328_v26, %v3327_v25  ;;  %v3345_v26 = vld [vmem:[%s6795_s4 + $0x40] sm:$0xff] }
 0x17e   :  { %4898 = vmatpush3.bf16.msra.mxu0 %v4897_v33  ;;  %4967 = vmatpush3.bf16.msra.mxu1 %v4966_v36  ;;  %v4975_v33 = vpack.c.bf16 %v3300_v31, %v3299_v29  ;;  %v3302_v36 = vld [vmem:[%s6793_s2 + $0x6a8] sm:$0xff] }
 0x17f   :  { %4923 = vmatprep.subr.bf16.mxu0 %v5284_v6  ;;  %4968 = vmatprep.subr.bf16.mxu1 %v5284_v6 }
 0x181   :  { %4220 = vmatmul.mubr.f32.vlgmr.msra.gmra.mrb[26].mxu0 %v5651_v48  ;;  %v3315_v48 = vld [vmem:[%s6793_s2 + $0x710] sm:$0xff] }
 0x182   :  { %4925 = vmatpush3.bf16.msra.mxu0 %v4924_v44  ;;  %4970 = vmatpush3.bf16.msra.mxu1 %v4969_v46  ;;  %v4999_v62 = vpack.c.bf16 %v3316_v58, %v3315_v48  ;;  %v3306_v44 = vld [vmem:[%s6793_s2 + $0x6c8] sm:$0xff]  ;;  %v3307_v46 = vld [vmem:[%s6793_s2 + $0x6d0] sm:$0xff]  ;;  %v3312_v58 = vld [vmem:[%s6793_s2 + $0x6f8] sm:$0xff] }
 0x183   :  { %4926 = vmatprep.subr.bf16.mxu0 %v5284_v6  ;;  %4995 = vmatprep.subr.bf16.mxu1 %v5284_v6  ;;  %v4987_v50 = vpack.c.bf16 %v3308_v47, %v3307_v46  ;;  %v3311_v48 = vld [vmem:[%s6793_s2 + $0x6f0] sm:$0xff]  ;;  %v1677_v46 = vld [vmem:[%s6795_s4 + $0x8] sm:$0xff] }
 0x184   :  { %4289 = vmatprep.mubr.msk.f32.mxu0 %vm5285_vm1, %v5286_v61 }
 0x185   :  { %4325 = vmatmul.mubr.f32.vlgmr.msra.gmra.mrb[10].mxu1 %v5779_v43  ;;  %v3317_v43 = vld [vmem:[%s6793_s2 + $0x720] sm:$0xff] }
 0x186   :  { %4928 = vmatpush3.bf16.msra.mxu0 %v4927_v52  ;;  %4997 = vmatpush3.bf16.msra.mxu1 %v4996_v54  ;;  %v5002_v40 = vpack.c.bf16 %v3318_v0, %v3317_v43  ;;  %v3310_v52 = vld [vmem:[%s6793_s2 + $0x6e8] sm:$0xff] }
 0x187   :  { %4929 = vmatprep.subr.bf16.mxu0 %v5284_v6  ;;  %4998 = vmatprep.subr.bf16.mxu1 %v5284_v6  ;;  %v4990_v55 = vpack.c.bf16 %v3310_v52, %v3309_v51  ;;  %v3330_v43 = vld [vmem:[%s6793_s2 + $0x788] sm:$0xff] }
 0x188   :  { %4394 = vmatprep.mubr.msk.f32.mxu1 %vm5285_vm1, %v5286_v61  ;;  %v5020_v0 = vpack.c.bf16 %v3330_v43, %v3329_v63 }
 0x18a   :  { %4931 = vmatpush3.bf16.msra.mxu0 %v4930_v59  ;;  %5000 = vmatpush3.bf16.msra.mxu1 %v4999_v62  ;;  %v4993_v62 = vpack.c.bf16 %v3312_v58, %v3311_v48 }
 0x18b   :  { %4932 = vmatprep.subr.bf16.mxu0 %v5284_v6  ;;  %5001 = vmatprep.subr.bf16.mxu1 %v5284_v6 }
 0x18e   :  { %4934 = vmatpush3.bf16.msra.mxu0 %v4933_v1  ;;  %5003 = vmatpush3.bf16.msra.mxu1 %v5002_v40  ;;  %v3331_v1 = vld [vmem:[%s6793_s2 + $0x790] sm:$0xff] }
 0x18f   :  { %4935 = vmatprep.subr.bf16.mxu0 %v5284_v6  ;;  %5004 = vmatprep.subr.bf16.mxu1 %v5284_v6  ;;  %v5023_v40 = vpack.c.bf16 %v3332_v2, %v3331_v1  ;;  %v2474_v2 = vld [vmem:[%s6797_s6] sm:$0xff] }
 0x192   :  { %4937 = vmatpush3.bf16.msra.mxu0 %v4936_v7  ;;  %5006 = vmatpush3.bf16.msra.mxu1 %v5005_v57  ;;  %v3338_v57 = vld [vmem:[%s6793_s2 + $0x7c8] sm:$0xff] }
 0x193   :  { %4938 = vmatprep.subr.bf16.mxu0 %v5284_v6  ;;  %5007 = vmatprep.subr.bf16.mxu1 %v5284_v6  ;;  %v5032_v9 = vpack.c.bf16 %v3338_v57, %v3337_v8 }
 0x196   :  { %4940 = vmatpush3.bf16.msra.mxu0 %v4939_v11  ;;  %5009 = vmatpush3.bf16.msra.mxu1 %v5008_v14  ;;  %v5035_v11 = vpack.c.bf16 %v3340_v10, %v3339_v32  ;;  %v3342_v14 = vld [vmem:[%s6793_s2 + $0x7e8] sm:$0xff]  ;;  %v1678_v32 = vld [vmem:[%s6795_s4 + $0x10] sm:$0xff]  ;;  %v1679_v10 = vld [vmem:[%s6795_s4 + $0x18] sm:$0xff] }
 0x197   :  { %4941 = vmatprep.subr.bf16.mxu0 %v5284_v6  ;;  %5010 = vmatprep.subr.bf16.mxu1 %v5284_v6  ;;  %v5038_v15 = vpack.c.bf16 %v3342_v14, %v3341_v12 }
 0x19a   :  { %4943 = vmatpush3.bf16.msra.mxu0 %v4942_v16  ;;  %5012 = vmatpush3.bf16.msra.mxu1 %v5011_v18  ;;  %v3343_v16 = vld [vmem:[%s6793_s2 + $0x7f0] sm:$0xff] }
 0x19b   :  { %4944 = vmatprep.subr.bf16.mxu0 %v5284_v6  ;;  %5013 = vmatprep.subr.bf16.mxu1 %v5284_v6  ;;  %v5041_v41 = vpack.c.bf16 %v3344_v17, %v3343_v16  ;;  %v1680_v17 = vld [vmem:[%s6795_s4 + $0x20] sm:$0xff] }
 0x19e   :  { %4946 = vmatpush3.bf16.msra.mxu0 %v4945_v20  ;;  %5015 = vmatpush3.bf16.msra.mxu1 %v5014_v23 }
 0x19f   :  { %4971 = vmatprep.subr.bf16.mxu0 %v5284_v6  ;;  %5016 = vmatprep.subr.bf16.mxu1 %v5284_v6 }
 0x1a1   :  { %4290 = vmatmul.mubr.f32.vlgmr.msra.gmra.mrb[28].mxu0 %v5669_v56  ;;  %v4978_v56 = vpack.c.bf16 %v3302_v36, %v3301_v34  ;;  %v3349_v34 = vld [vmem:[%s6795_s4 + $0x60] sm:$0xff]  ;;  %v3350_v36 = vld [vmem:[%s6795_s4 + $0x68] sm:$0xff] }
 0x1a2   :  { %4973 = vmatpush3.bf16.msra.mxu0 %v4972_v27  ;;  %5018 = vmatpush3.bf16.msra.mxu1 %v5017_v28  ;;  %v3348_v28 = vld [vmem:[%s6795_s4 + $0x58] sm:$0xff]  ;;  %v5051_v38 = vpack.c.bf16 %v3350_v36, %v3349_v34  ;;  %v3361_v34 = vld [vmem:[%s6795_s4 + $0xa0] sm:$0xff]  ;;  %v3362_v36 = vld [vmem:[%s6795_s4 + $0xa8] sm:$0xff] }
 0x1a3   :  { %4974 = vmatprep.subr.bf16.mxu0 %v5284_v6  ;;  %4359 = vmatprep.mubr.msk.f32.mxu0 %vm5285_vm1, %v5286_v61 }
 0x1a5   :  { %4395 = vmatmul.mubr.f32.vlgmr.msra.gmra.mrb[12].mxu1 %v5901_v35  ;;  %v3305_v35 = vld [vmem:[%s6793_s2 + $0x6c0] sm:$0xff] }
 0x1a6   :  { %4976 = vmatpush3.bf16.msra.mxu0 %v4975_v33  ;;  %v4984_v45 = vpack.c.bf16 %v3306_v44, %v3305_v35  ;;  %v3352_v35 = vld [vmem:[%s6795_s4 + $0x78] sm:$0xff]  ;;  %v1676_v44 = vld [vmem:[%s6795_s4] sm:$0xff] }
 0x1a7   :  { %4977 = vmatprep.subr.bf16.mxu0 %v5284_v6 }
 0x1aa   :  { %4979 = vmatpush3.bf16.msra.mxu0 %v4978_v56 }
 0x1ab   :  { %4980 = vmatprep.subr.bf16.mxu0 %v5284_v6 }
 0x1ae   :  { %4982 = vmatpush3.bf16.msra.mxu0 %v4981_v42  ;;  %v3351_v42 = vld [vmem:[%s6795_s4 + $0x70] sm:$0xff] }
 0x1af   :  { %4983 = vmatprep.subr.bf16.mxu0 %v5284_v6 }
 0x1b2   :  { %4985 = vmatpush3.bf16.msra.mxu0 %v4984_v45  ;;  %v5055_v45 = vpack.c.bf16 %v3352_v35, %v3351_v42  ;;  %v3367_v35 = vld [vmem:[%s6795_s4 + $0xc0] sm:$0xff] }
 0x1b3   :  { %4986 = vmatprep.subr.bf16.mxu0 %v5284_v6 }
 0x1b4   :  { %v343_v53 = vpop.f32.mrb[16].mxu0 }
 0x1b5   :  { %348 = vst.msk [vmem:[#allocation2] sm:$0xff] %vm347_vm2, %v343_v53  ;;  %v3906_v54 = vpop.f32.mrb[17].mxu0 }
 0x1b6   :  { %4988 = vmatpush3.bf16.msra.mxu0 %v4987_v50  ;;  %v5059_v50 = vpack.c.bf16 %v1677_v46, %v1676_v44  ;;  %v3368_v44 = vld [vmem:[%s6795_s4 + $0xc8] sm:$0xff] }
 0x1b7   :  { %4989 = vmatprep.subr.bf16.mxu0 %v5284_v6 }
 0x1b8   :  { %v520_v59 = vpop.f32.mrb[0].mxu1 }
 0x1b9   :  { %524 = vst.msk [vmem:[#allocation2 + $0x10] sm:$0xff] %vm347_vm2, %v520_v59  ;;  %v3976_v60 = vpop.f32.mrb[1].mxu1 }
 0x1ba   :  { %4991 = vmatpush3.bf16.msra.mxu0 %v4990_v55 }
 0x1bb   :  { %4992 = vmatprep.subr.bf16.mxu0 %v5284_v6 }
 0x1be   :  { %4994 = vmatpush3.bf16.msra.mxu0 %v4993_v62 }
 0x1bf   :  { %5019 = vmatprep.subr.bf16.mxu0 %v5284_v6 }
 0x1c1   :  { %4360 = vmatmul.mubr.f32.vlgmr.msra.gmra.mrb[30].mxu0 %v5766_v37  ;;  %v3335_v37 = vld [vmem:[%s6793_s2 + $0x7b0] sm:$0xff] }
 0x1c2   :  { %5021 = vmatpush3.bf16.msra.mxu0 %v5020_v0  ;;  %4429 = vmatprep.mubr.msk.f32.mxu0 %vm5285_vm1, %v5286_v61  ;;  %v3336_v61 = vld [vmem:[%s6793_s2 + $0x7b8] sm:$0xff] }
 0x1c3   :  { %5022 = vmatprep.subr.bf16.mxu0 %v5284_v6  ;;  %v5029_v7 = vpack.c.bf16 %v3336_v61, %v3335_v37  ;;  %v2478_v61 = vld [vmem:[%s6797_s6 + $0x20] sm:$0xff] }
 0x1c6   :  { %5024 = vmatpush3.bf16.msra.mxu0 %v5023_v40  ;;  %v2475_v40 = vld [vmem:[%s6797_s6 + $0x8] sm:$0xff] }
 0x1c7   :  { %5025 = vmatprep.subr.bf16.mxu0 %v5284_v6  ;;  %v5171_v4 = vpack.c.bf16 %v2475_v40, %v2474_v2 }
 0x1ca   :  { %5027 = vmatpush3.bf16.msra.mxu0 %v5026_v5  ;;  %v2477_v5 = vld [vmem:[%s6797_s6 + $0x18] sm:$0xff] }
 0x1cb   :  { %5028 = vmatprep.subr.bf16.mxu0 %v5284_v6  ;;  %v5175_v37 = vpack.c.bf16 %v2477_v5, %v2476_v3  ;;  %v3379_v3 = vld [vmem:[%s6795_s4 + $0x110] sm:$0xff] }
 0x1ce   :  { %5030 = vmatpush3.bf16.msra.mxu0 %v5029_v7  ;;  %v2479_v7 = vld [vmem:[%s6797_s6 + $0x28] sm:$0xff] }
 0x1cf   :  { %5031 = vmatprep.subr.bf16.mxu0 %v5284_v6  ;;  %v5179_v57 = vpack.c.bf16 %v2479_v7, %v2478_v61 }
 0x1d2   :  { %5033 = vmatpush3.bf16.msra.mxu0 %v5032_v9 }
 0x1d3   :  { %5034 = vmatprep.subr.bf16.mxu0 %v5284_v6 }
 0x1d4   :  { %v432_v22 = vpop.f32.mrb[18].mxu0 }
 0x1d5   :  { %436 = vst.msk [vmem:[#allocation2 + $0x8] sm:$0xff] %vm347_vm2, %v432_v22  ;;  %v3941_v49 = vpop.f32.mrb[19].mxu0 }
 0x1d6   :  { %5036 = vmatpush3.bf16.msra.mxu0 %v5035_v11 }
 0x1d7   :  { %5037 = vmatprep.subr.bf16.mxu0 %v5284_v6 }
 0x1d8   :  { %v696_v18 = vpop.f32.mrb[2].mxu1 }
 0x1d9   :  { %700 = vst.msk [vmem:[#allocation2 + $0x20] sm:$0xff] %vm347_vm2, %v696_v18  ;;  %v4046_v13 = vpop.f32.mrb[3].mxu1  ;;  %v1681_v18 = vld [vmem:[%s6795_s4 + $0x28] sm:$0xff] }
 0x1da   :  { %5039 = vmatpush3.bf16.msra.mxu0 %v5038_v15  ;;  %v5063_v15 = vpack.c.bf16 %v1679_v10, %v1678_v32  ;;  %v5067_v13 = vpack.c.bf16 %v1681_v18, %v1680_v17  ;;  %v3382_v32 = vld [vmem:[%s6795_s4 + $0x128] sm:$0xff]  ;;  %v3389_v17 = vld [vmem:[%s6795_s4 + $0x150] sm:$0xff]  ;;  %v3390_v18 = vld [vmem:[%s6795_s4 + $0x158] sm:$0xff] }
 0x1db   :  { %5040 = vmatprep.subr.bf16.mxu0 %v5284_v6  ;;  %v3346_v6 = vld [vmem:[%s6795_s4 + $0x48] sm:$0xff] }
 0x1dc   :  { %v5043_v27 = vpack.c.bf16 %v3346_v6, %v3345_v26  ;;  %v3359_v26 = vld [vmem:[%s6795_s4 + $0x90] sm:$0xff]  ;;  %v3360_v6 = vld [vmem:[%s6795_s4 + $0x98] sm:$0xff] }
 0x1de   :  { %5042 = vmatpush3.bf16.msra.mxu0 %v5041_v41  ;;  %5044 = vmatprep.subr.bf16.mxu1 %v5043_v27  ;;  %v1682_v41 = vld [vmem:[%s6795_s4 + $0x30] sm:$0xff] }
 0x1df   :  { %5046 = vmatpush3.bf16.msra.mxu1 %v5043_v27  ;;  %5172 = vmatprep.subr.bf16.mxu0 %v5171_v4 }
 0x1e1   :  { %4430 = vmatmul.mubr.f32.vlgmr.msra.gmra.mrb[32].mxu0 %v5888_v30  ;;  %v3347_v30 = vld [vmem:[%s6795_s4 + $0x50] sm:$0xff] }
 0x1e2   :  { %v5047_v29 = vpack.c.bf16 %v3348_v28, %v3347_v30  ;;  %5174 = vmatpush3.bf16.msra.mxu0 %v5171_v4  ;;  %v3380_v4 = vld [vmem:[%s6795_s4 + $0x118] sm:$0xff] }
 0x1e3   :  { %5176 = vmatprep.subr.bf16.mxu0 %v5175_v37 }
 0x1e4   :  { %5048 = vmatprep.subr.bf16.mxu1 %v5047_v29 }
 0x1e5   :  { %5050 = vmatpush3.bf16.msra.mxu1 %v5047_v29 }
 0x1e6   :  { %5052 = vmatprep.subr.bf16.mxu1 %v5051_v38  ;;  %5178 = vmatpush3.bf16.msra.mxu0 %v5175_v37 }
 0x1e7   :  { %5180 = vmatprep.subr.bf16.mxu0 %v5179_v57 }
 0x1e9   :  { %5054 = vmatpush3.bf16.msra.mxu1 %v5051_v38  ;;  %v3363_v38 = vld [vmem:[%s6795_s4 + $0xb0] sm:$0xff] }
 0x1ea   :  { %5056 = vmatprep.subr.bf16.mxu1 %v5055_v45  ;;  %5182 = vmatpush3.bf16.msra.mxu0 %v5179_v57 }
 0x1ed   :  { %5058 = vmatpush3.bf16.msra.mxu1 %v5055_v45  ;;  %v5091_v45 = vpack.c.bf16 %v3368_v44, %v3367_v35 }
 0x1ee   :  { %5060 = vmatprep.subr.bf16.mxu1 %v5059_v50 }
 0x1f4   :  { %v608_v19 = vpop.f32.mrb[20].mxu0 }
 0x1f5   :  { %612 = vst.msk [vmem:[#allocation2 + $0x18] sm:$0xff] %vm347_vm2, %v608_v19  ;;  %v4011_v20 = vpop.f32.mrb[21].mxu0  ;;  %v1683_v19 = vld [vmem:[%s6795_s4 + $0x38] sm:$0xff] }
 0x1f6   :  { %v5071_v20 = vpack.c.bf16 %v1683_v19, %v1682_v41 }
 0x1f8   :  { %v872_v21 = vpop.f32.mrb[4].mxu1 }
 0x1f9   :  { %876 = vst.msk [vmem:[#allocation2 + $0x30] sm:$0xff] %vm347_vm2, %v872_v21  ;;  %v4116_v23 = vpop.f32.mrb[5].mxu1  ;;  %v3357_v21 = vld [vmem:[%s6795_s4 + $0x80] sm:$0xff] }
 0x1fa   :  { %v3358_v23 = vld [vmem:[%s6795_s4 + $0x88] sm:$0xff] }
 0x1fc   :  { %v1685_v52 = vld [vmem:[#allocation2 + $0x1] ss:$8 sm:$0xf]  ;;  %v1669_v49 = vld [vmem:[#allocation2] ss:$8 sm:$0xf] }
 0x1fd   :  { %v1864_v29 = vld [vmem:[#allocation2 + $0x2] ss:$8 sm:$0xf]  ;;  %v2064_v7 = vld [vmem:[#allocation2 + $0x4] ss:$8 sm:$0xf] }
 0x214   :  { %v784_v24 = vpop.f32.mrb[22].mxu0 }
 0x215   :  { %788 = vst.msk [vmem:[#allocation2 + $0x28] sm:$0xff] %vm347_vm2, %v784_v24  ;;  %v4081_v25 = vpop.f32.mrb[23].mxu0  ;;  %v5075_v24 = vpack.c.bf16 %v3358_v23, %v3357_v21  ;;  %v5127_v21 = vpack.c.bf16 %v3390_v18, %v3389_v17  ;;  %v2587_v17 = vld [vmem:[%s6799_s8 + $0x8] sm:$0xff] }
 0x218   :  { %v1048_v31 = vpop.f32.mrb[6].mxu1 }
 0x219   :  { %1052 = vst.msk [vmem:[#allocation2 + $0x40] sm:$0xff] %vm347_vm2, %v1048_v31  ;;  %v4186_v33 = vpop.f32.mrb[7].mxu1  ;;  %v5079_v31 = vpack.c.bf16 %v3360_v6, %v3359_v26  ;;  %v3393_v6 = vld [vmem:[%s6795_s4 + $0x170] sm:$0xff] }
 0x234   :  { %v960_v56 = vpop.f32.mrb[24].mxu0 }
 0x235   :  { %964 = vst.msk [vmem:[#allocation2 + $0x38] sm:$0xff] %vm347_vm2, %v960_v56  ;;  %v4151_v39 = vpop.f32.mrb[25].mxu0  ;;  %v5083_v56 = vpack.c.bf16 %v3362_v36, %v3361_v34  ;;  %v3399_v34 = vld [vmem:[%s6795_s4 + $0x190] sm:$0xff]  ;;  %v3400_v36 = vld [vmem:[%s6795_s4 + $0x198] sm:$0xff] }
 0x236   :  { %v3364_v39 = vld [vmem:[%s6795_s4 + $0xb8] sm:$0xff]  ;;  %v5143_v35 = vpack.c.bf16 %v3400_v36, %v3399_v34  ;;  %v2592_v36 = vld [vmem:[%s6799_s8 + $0x30] sm:$0xff] }
 0x237   :  { %v5087_v42 = vpack.c.bf16 %v3364_v39, %v3363_v38 }
 0x238   :  { %v1224_v47 = vpop.f32.mrb[8].mxu1 }
 0x239   :  { %1228 = vst.msk [vmem:[#allocation2 + $0x50] sm:$0xff] %vm347_vm2, %v1224_v47  ;;  %v4256_v51 = vpop.f32.mrb[9].mxu1  ;;  %v3369_v47 = vld [vmem:[%s6795_s4 + $0xd0] sm:$0xff] }
 0x23c   :  { %v1686_v53 = vld [vmem:[#allocation2 + $0x1] ss:$8 sm:$0xf0]  ;;  %v1670_v11 = vld [vmem:[#allocation2] ss:$8 sm:$0xf0] }
 0x23d   :  { %v1687_v54 = vor.u32 %v1686_v53, %v1685_v52  ;;  %v1671_v16 = vor.u32 %v1670_v11, %v1669_v49  ;;  %v1865_v30 = vld [vmem:[#allocation2 + $0x2] ss:$8 sm:$0xf0]  ;;  %v1965_v51 = vld [vmem:[#allocation2 + $0x3] ss:$8 sm:$0xf0] }
 0x23e   :  { %v1866_v33 = vor.u32 %v1865_v30, %v1864_v29  ;;  %v2065_v5 = vld [vmem:[#allocation2 + $0x4] ss:$8 sm:$0xf0] }
 0x23f   :  { %4448 = vmatprep.mubr.msk.f32.mxu1 %vm347_vm2, %v1687_v54  ;;  %v1964_v54 = vld [vmem:[#allocation2 + $0x3] ss:$8 sm:$0xf]  ;;  %v2066_v57 = vor.u32 %v2065_v5, %v2064_v7 }
 0x240   :  { %v3383_v11 = vld [vmem:[%s6795_s4 + $0x130] sm:$0xff]  ;;  %v3388_v49 = vld [vmem:[%s6795_s4 + $0x148] sm:$0xff]  ;;  %v3394_v30 = vld [vmem:[%s6795_s4 + $0x178] sm:$0xff] }
 0x241   :  { %v3398_v29 = vld [vmem:[%s6795_s4 + $0x188] sm:$0xff]  ;;  %v3414_v5 = vld [vmem:[%s6795_s4 + $0x1f8] sm:$0xff] }
 0x254   :  { %v1136_v55 = vpop.f32.mrb[26].mxu0 }
 0x255   :  { %1140 = vst.msk [vmem:[#allocation2 + $0x48] sm:$0xff] %vm347_vm2, %v1136_v55  ;;  %v4221_v48 = vpop.f32.mrb[27].mxu0 }
 0x256   :  { %v1966_v48 = vor.u32 %v1965_v51, %v1964_v54  ;;  %v3404_v51 = vld [vmem:[%s6795_s4 + $0x1b8] sm:$0xff]  ;;  %v3408_v54 = vld [vmem:[%s6795_s4 + $0x1c8] sm:$0xff] }
 0x258   :  { %v1400_v58 = vpop.f32.mrb[10].mxu1 }
 0x259   :  { %1404 = vst.msk [vmem:[#allocation2 + $0x60] sm:$0xff] %vm347_vm2, %v1400_v58  ;;  %v4326_v59 = vpop.f32.mrb[11].mxu1  ;;  %v3371_v58 = vld [vmem:[%s6795_s4 + $0xe0] sm:$0xff] }
 0x25a   :  { %v3372_v59 = vld [vmem:[%s6795_s4 + $0xe8] sm:$0xff] }
 0x274   :  { %v1312_v60 = vpop.f32.mrb[28].mxu0 }
 0x275   :  { %1316 = vst.msk [vmem:[#allocation2 + $0x58] sm:$0xff] %vm347_vm2, %v1312_v60  ;;  %v4291_v62 = vpop.f32.mrb[29].mxu0  ;;  %v5099_v60 = vpack.c.bf16 %v3372_v59, %v3371_v58  ;;  %v3409_v58 = vld [vmem:[%s6795_s4 + $0x1d0] sm:$0xff]  ;;  %v3410_v59 = vld [vmem:[%s6795_s4 + $0x1d8] sm:$0xff] }
 0x276   :  { %v3373_v62 = vld [vmem:[%s6795_s4 + $0xf0] sm:$0xff] }
 0x278   :  { %v1576_v63 = vpop.f32.mrb[12].mxu1 }
 0x279   :  { %1580 = vst.msk [vmem:[#allocation2 + $0x70] sm:$0xff] %vm347_vm2, %v1576_v63  ;;  %v4396_v43 = vpop.f32.mrb[13].mxu1  ;;  %v3374_v63 = vld [vmem:[%s6795_s4 + $0xf8] sm:$0xff] }
 0x27a   :  { %v5103_v43 = vpack.c.bf16 %v3374_v63, %v3373_v62 }
 0x27c   :  { %v1689_v12 = vld [vmem:[#allocation2 + $0x41] ss:$8 sm:$0xf]  ;;  %v1673_v27 = vld [vmem:[#allocation2 + $0x40] ss:$8 sm:$0xf] }
 0x27d   :  { %v1868_v52 = vld [vmem:[#allocation2 + $0x42] ss:$8 sm:$0xf]  ;;  %v1968_v37 = vld [vmem:[#allocation2 + $0x43] ss:$8 sm:$0xf] }
 0x27e   :  { %v2068_v41 = vld [vmem:[#allocation2 + $0x44] ss:$8 sm:$0xf]  ;;  %v2168_v38 = vld [vmem:[#allocation2 + $0x45] ss:$8 sm:$0xf] }
 0x27f   :  { %v2268_v62 = vld [vmem:[#allocation2 + $0x46] ss:$8 sm:$0xf]  ;;  %v2368_v7 = vld [vmem:[#allocation2 + $0x47] ss:$8 sm:$0xf] }
 0x294   :  { %v1488_v0 = vpop.f32.mrb[30].mxu0 }
 0x295   :  { %1492 = vst.msk [vmem:[#allocation2 + $0x68] sm:$0xff] %vm347_vm2, %v1488_v0  ;;  %v4361_v1 = vpop.f32.mrb[31].mxu0  ;;  %v3377_v0 = vld [vmem:[%s6795_s4 + $0x100] sm:$0xff] }
 0x296   :  { %v3378_v1 = vld [vmem:[%s6795_s4 + $0x108] sm:$0xff] }
 0x297   :  { %v5107_v2 = vpack.c.bf16 %v3378_v1, %v3377_v0  ;;  %v5159_v0 = vpack.c.bf16 %v3410_v59, %v3409_v58 }
 0x2b4   :  { %v1664_v8 = vpop.f32.mrb[32].mxu0 }
 0x2b5   :  { %1668 = vst.msk [vmem:[#allocation2 + $0x78] sm:$0xff] %vm347_vm2, %v1664_v8  ;;  %v4431_v9 = vpop.f32.mrb[33].mxu0  ;;  %v5111_v8 = vpack.c.bf16 %v3380_v4, %v3379_v3  ;;  %v3413_v4 = vld [vmem:[%s6795_s4 + $0x1f0] sm:$0xff] }
 0x2b6   :  { %v3381_v9 = vld [vmem:[%s6795_s4 + $0x120] sm:$0xff] }
 0x2b7   :  { %v5115_v10 = vpack.c.bf16 %v3382_v32, %v3381_v9  ;;  %v2481_v9 = vld [vmem:[%s6797_s6 + $0x38] sm:$0xff] }
 0x2bc   :  { %v1690_v14 = vld [vmem:[#allocation2 + $0x41] ss:$8 sm:$0xf0]  ;;  %v1674_v25 = vld [vmem:[#allocation2 + $0x40] ss:$8 sm:$0xf0] }
 0x2bd   :  { %v1691_v22 = vor.u32 %v1690_v14, %v1689_v12  ;;  %v1675_v28 = vor.u32 %v1674_v25, %v1673_v27  ;;  %v1869_v46 = vld [vmem:[#allocation2 + $0x42] ss:$8 sm:$0xf0]  ;;  %v1969_v40 = vld [vmem:[#allocation2 + $0x43] ss:$8 sm:$0xf0]  ;;  %v5135_v27 = vpack.c.bf16 %v3394_v30, %v3393_v6 }
 0x2be   :  { %v1870_v53 = vor.u32 %v1869_v46, %v1868_v52  ;;  %v1970_v61 = vor.u32 %v1969_v40, %v1968_v37  ;;  %v3384_v12 = vld [vmem:[%s6795_s4 + $0x138] sm:$0xff]  ;;  %v3392_v25 = vld [vmem:[%s6795_s4 + $0x168] sm:$0xff]  ;;  %v5167_v37 = vpack.c.bf16 %v3414_v5, %v3413_v4  ;;  %v2590_v6 = vld [vmem:[%s6799_s8 + $0x20] sm:$0xff] }
 0x2bf   :  { %4449 = vmatmul.mubr.msk.f32.vlgmr.msra.gmra.mrb[14].mxu1 %vm347_vm2, %v1691_v22  ;;  %v5119_v14 = vpack.c.bf16 %v3384_v12, %v3383_v11  ;;  %v3387_v22 = vld [vmem:[%s6795_s4 + $0x140] sm:$0xff]  ;;  %v3402_v46 = vld [vmem:[%s6795_s4 + $0x1a8] sm:$0xff] }
 0x2c0   :  { %5062 = vmatpush3.bf16.msra.mxu1 %v5059_v50  ;;  %4467 = vmatprep.mubr.msk.f32.mxu1 %vm347_vm2, %v1671_v16  ;;  %v3370_v50 = vld [vmem:[%s6795_s4 + $0xd8] sm:$0xff]  ;;  %v3412_v40 = vld [vmem:[%s6795_s4 + $0x1e8] sm:$0xff] }
 0x2c1   :  { %5064 = vmatprep.subr.bf16.mxu1 %v5063_v15  ;;  %v5095_v55 = vpack.c.bf16 %v3370_v50, %v3369_v47  ;;  %v2069_v16 = vld [vmem:[#allocation2 + $0x44] ss:$8 sm:$0xf0] }
 0x2c2   :  { %v2070_v19 = vor.u32 %v2069_v16, %v2068_v41  ;;  %v3403_v50 = vld [vmem:[%s6795_s4 + $0x1b0] sm:$0xff]  ;;  %v2586_v16 = vld [vmem:[%s6799_s8] sm:$0xff] }
 0x2c3   :  { %v5151_v52 = vpack.c.bf16 %v3404_v51, %v3403_v50  ;;  %v2594_v18 = vmul.f32 %v2586_v16, %v2586_v16  ;;  %v2588_v41 = vld [vmem:[%s6799_s8 + $0x10] sm:$0xff]  ;;  %v3418_v51 = vld [vmem:[%s6798_s7] ss:$0 sm:$0xff] }
 0x2c4   :  { %5066 = vmatpush3.bf16.msra.mxu1 %v5063_v15  ;;  %v5123_v15 = vpack.c.bf16 %v3388_v49, %v3387_v22 }
 0x2c5   :  { %5068 = vmatprep.subr.bf16.mxu1 %v5067_v13 }
 0x2c8   :  { %5070 = vmatpush3.bf16.msra.mxu1 %v5067_v13  ;;  %v2165_v13 = vld [vmem:[#allocation2 + $0x5] ss:$8 sm:$0xf0] }
 0x2c9   :  { %5072 = vmatprep.subr.bf16.mxu1 %v5071_v20 }
 0x2cc   :  { %5074 = vmatpush3.bf16.msra.mxu1 %v5071_v20  ;;  %v2164_v20 = vld [vmem:[#allocation2 + $0x5] ss:$8 sm:$0xf] }
 0x2cd   :  { %5076 = vmatprep.subr.bf16.mxu1 %v5075_v24  ;;  %v2166_v23 = vor.u32 %v2165_v13, %v2164_v20  ;;  %v2595_v13 = vmul.f32 %v2587_v17, %v2587_v17  ;;  %v2603_v20 = vsel %vm2602_vm3, %v2594_v18, 0.0 }
 0x2cf   :  { %4468 = vmatmul.mubr.msk.f32.vlgmr.msra.gmra.mrb[14].mxu1 %vm347_vm2, %v1675_v28  ;;  %v3397_v28 = vld [vmem:[%s6795_s4 + $0x180] sm:$0xff] }
 0x2d0   :  { %5078 = vmatpush3.bf16.msra.mxu1 %v5075_v24  ;;  %4486 = vmatprep.mubr.msk.f32.mxu1 %vm347_vm2, %v1866_v33  ;;  %v3391_v24 = vld [vmem:[%s6795_s4 + $0x160] sm:$0xff] }
 0x2d1   :  { %5080 = vmatprep.subr.bf16.mxu1 %v5079_v31  ;;  %v5131_v26 = vpack.c.bf16 %v3392_v25, %v3391_v24  ;;  %v2169_v33 = vld [vmem:[#allocation2 + $0x45] ss:$8 sm:$0xf0] }
 0x2d2   :  { %v2170_v39 = vor.u32 %v2169_v33, %v2168_v38  ;;  %v2600_v38 = vmul.f32 %v2592_v36, %v2592_v36 }
 0x2d4   :  { %5082 = vmatpush3.bf16.msra.mxu1 %v5079_v31  ;;  %v5139_v31 = vpack.c.bf16 %v3398_v29, %v3397_v28  ;;  %v2591_v29 = vld [vmem:[%s6799_s8 + $0x28] sm:$0xff] }
 0x2d5   :  { %5084 = vmatprep.subr.bf16.mxu1 %v5083_v56  ;;  %v2599_v33 = vmul.f32 %v2591_v29, %v2591_v29 }
 0x2d8   :  { %5086 = vmatpush3.bf16.msra.mxu1 %v5083_v56  ;;  %v2265_v56 = vld [vmem:[#allocation2 + $0x6] ss:$8 sm:$0xf0] }
 0x2d9   :  { %5088 = vmatprep.subr.bf16.mxu1 %v5087_v42 }
 0x2dc   :  { %5090 = vmatpush3.bf16.msra.mxu1 %v5087_v42  ;;  %v2264_v42 = vld [vmem:[#allocation2 + $0x6] ss:$8 sm:$0xf] }
 0x2dd   :  { %5092 = vmatprep.subr.bf16.mxu1 %v5091_v45  ;;  %v2266_v44 = vor.u32 %v2265_v56, %v2264_v42  ;;  %v2593_v42 = vld [vmem:[%s6799_s8 + $0x38] sm:$0xff] }
 0x2df   :  { %4487 = vmatmul.mubr.msk.f32.vlgmr.msra.gmra.mrb[14].mxu1 %vm347_vm2, %v1870_v53  ;;  %v3407_v53 = vld [vmem:[%s6795_s4 + $0x1c0] sm:$0xff] }
 0x2e0   :  { %5094 = vmatpush3.bf16.msra.mxu1 %v5091_v45  ;;  %4505 = vmatprep.mubr.msk.f32.mxu1 %vm347_vm2, %v1966_v48  ;;  %v3401_v45 = vld [vmem:[%s6795_s4 + $0x1a0] sm:$0xff] }
 0x2e1   :  { %5096 = vmatprep.subr.bf16.mxu1 %v5095_v55  ;;  %v5147_v47 = vpack.c.bf16 %v3402_v46, %v3401_v45  ;;  %v2269_v48 = vld [vmem:[#allocation2 + $0x46] ss:$8 sm:$0xf0]  ;;  %v2614_v45 = vsel %vm2602_vm3, %v2600_v38, 0.0 }
 0x2e2   :  { %v2270_v63 = vor.u32 %v2269_v48, %v2268_v62 }
 0x2e4   :  { %5098 = vmatpush3.bf16.msra.mxu1 %v5095_v55  ;;  %v5155_v55 = vpack.c.bf16 %v3408_v54, %v3407_v53 }
 0x2e5   :  { %5100 = vmatprep.subr.bf16.mxu1 %v5099_v60 }
 0x2e8   :  { %5102 = vmatpush3.bf16.msra.mxu1 %v5099_v60  ;;  %v2365_v60 = vld [vmem:[#allocation2 + $0x7] ss:$8 sm:$0xf0] }
 0x2e9   :  { %5104 = vmatprep.subr.bf16.mxu1 %v5103_v43 }
 0x2ec   :  { %5106 = vmatpush3.bf16.msra.mxu1 %v5103_v43  ;;  %v2364_v43 = vld [vmem:[#allocation2 + $0x7] ss:$8 sm:$0xf] }
 0x2ed   :  { %5108 = vmatprep.subr.bf16.mxu1 %v5107_v2  ;;  %v2366_v1 = vor.u32 %v2365_v60, %v2364_v43 }
 0x2ef   :  { %4506 = vmatmul.mubr.msk.f32.vlgmr.msra.gmra.mrb[14].mxu1 %vm347_vm2, %v1970_v61  ;;  %v2369_v61 = vld [vmem:[#allocation2 + $0x47] ss:$8 sm:$0xf0] }
 0x2f0   :  { %5110 = vmatpush3.bf16.msra.mxu1 %v5107_v2  ;;  %4524 = vmatprep.mubr.msk.f32.mxu1 %vm347_vm2, %v2066_v57  ;;  %v3411_v2 = vld [vmem:[%s6795_s4 + $0x1e0] sm:$0xff]  ;;  %v2480_v57 = vld [vmem:[%s6797_s6 + $0x30] sm:$0xff] }
 0x2f1   :  { %5112 = vmatprep.subr.bf16.mxu1 %v5111_v8  ;;  %v5163_v3 = vpack.c.bf16 %v3412_v40, %v3411_v2  ;;  %v5183_v32 = vpack.c.bf16 %v2481_v9, %v2480_v57 }
 0x2f3   :  { %5184 = vmatprep.subr.bf16.mxu0 %v5183_v32 }
 0x2f4   :  { %5114 = vmatpush3.bf16.msra.mxu1 %v5111_v8  ;;  %v2370_v8 = vor.u32 %v2369_v61, %v2368_v7  ;;  %5186 = vmatpush3.bf16.msra.mxu0 %v5183_v32 }
 0x2f5   :  { %5116 = vmatprep.subr.bf16.mxu1 %v5115_v10 }
 0x2f8   :  { %5118 = vmatpush3.bf16.msra.mxu1 %v5115_v10  ;;  %v3417_v10 = vld [vmem:[%s6796_s5] ss:$0 sm:$0xff] }
 0x2f9   :  { %5120 = vmatprep.subr.bf16.mxu1 %v5119_v14 }
 0x2fc   :  { %5122 = vmatpush3.bf16.msra.mxu1 %v5119_v14 }
 0x2fd   :  { %5124 = vmatprep.subr.bf16.mxu1 %v5123_v15 }
 0x2ff   :  { %4525 = vmatmul.mubr.msk.f32.vlgmr.msra.gmra.mrb[14].mxu1 %vm347_vm2, %v2070_v19  ;;  %v2596_v19 = vmul.f32 %v2588_v41, %v2588_v41 }
 0x300   :  { %5126 = vmatpush3.bf16.msra.mxu1 %v5123_v15  ;;  %4543 = vmatprep.mubr.msk.f32.mxu1 %vm347_vm2, %v2166_v23  ;;  %v2589_v23 = vld [vmem:[%s6799_s8 + $0x18] sm:$0xff] }
 0x301   :  { %5128 = vmatprep.subr.bf16.mxu1 %v5127_v21  ;;  %v2597_v25 = vmul.f32 %v2589_v23, %v2589_v23 }
 0x303   :  { %v2608_v28 = vsel %vm2602_vm3, %v2597_v25, 0.0 }
 0x304   :  { %5130 = vmatpush3.bf16.msra.mxu1 %v5127_v21  ;;  %v2604_v21 = vsel %vm2602_vm3, %v2595_v13, 0.0 }
 0x305   :  { %5132 = vmatprep.subr.bf16.mxu1 %v5131_v26  ;;  %v2605_v24 = vadd.f32 %v2604_v21, %v2603_v20  ;;  %v2743_v21 = vld [vmem:[%s6800_s9 + $0x10] sm:$0xff] }
 0x308   :  { %5134 = vmatpush3.bf16.msra.mxu1 %v5131_v26  ;;  %v2606_v26 = vsel %vm2602_vm3, %v2596_v19, 0.0 }
 0x309   :  { %5136 = vmatprep.subr.bf16.mxu1 %v5135_v27  ;;  %v2607_v30 = vadd.f32 %v2606_v26, %v2605_v24 }
 0x30c   :  { %5138 = vmatpush3.bf16.msra.mxu1 %v5135_v27  ;;  %v2598_v27 = vmul.f32 %v2590_v6, %v2590_v6 }
 0x30d   :  { %5140 = vmatprep.subr.bf16.mxu1 %v5139_v31 }
 0x30e   :  { %v2610_v34 = vsel %vm2602_vm3, %v2598_v27, 0.0 }
 0x30f   :  { %4544 = vmatmul.mubr.msk.f32.vlgmr.msra.gmra.mrb[14].mxu1 %vm347_vm2, %v2170_v39  ;;  %v2612_v39 = vsel %vm2602_vm3, %v2599_v33, 0.0  ;;  %v2839_v33 = vld [vmem:[%s6802_s11] sm:$0xf] }
 0x310   :  { %5142 = vmatpush3.bf16.msra.mxu1 %v5139_v31  ;;  %4562 = vmatprep.mubr.msk.f32.mxu1 %vm347_vm2, %v2266_v44  ;;  %v2609_v31 = vadd.f32 %v2608_v28, %v2607_v30  ;;  %v2601_v44 = vmul.f32 %v2593_v42, %v2593_v42  ;;  %v2746_v30 = vld [vmem:[%s6800_s9 + $0x28] sm:$0xff]  ;;  %v2747_v28 = vld [vmem:[%s6800_s9 + $0x30] sm:$0xff] }
 0x311   :  { %5144 = vmatprep.subr.bf16.mxu1 %v5143_v35 }
 0x312   :  { %v2611_v56 = vadd.f32 %v2610_v34, %v2609_v31  ;;  %v2837_v34 = vld [vmem:[%s6794_s3] sm:$0xff] }
 0x314   :  { %5146 = vmatpush3.bf16.msra.mxu1 %v5143_v35  ;;  %v2613_v35 = vadd.f32 %v2612_v39, %v2611_v56  ;;  %v2926_v56 = vld [vmem:[%s6803_s12] sm:$0xf]  ;;  %s5290_s12 = smov [#allocation3]  }
 0x315   :  { %5148 = vmatprep.subr.bf16.mxu1 %v5147_v47  ;;  %s3074_s7 = sshll.u32 %s5290_s12, 4  ;;  %s3075_s7 = int_to_ptr.vmem [resolvable:$true] %s3074_s7 }
 0x316   :  { %v2615_v46 = vadd.f32 %v2614_v45, %v2613_v35  ;;  %s5260_s8 = scalar_lea.vmem %s3075_s7, 256  ;;  %p5265_p1 = scmp.lt.s32.totalorder %s3075_s7, %s3075_s7 }
 0x317   :  { %p5261_p0 = scmp.ne.s32.totalorder %s3075_s7, %s5260_s8  ;;  %p5266_p2 = scmp.lt.s32.totalorder %s5260_s8, %s5260_s8 }
 0x318   :  { %5150 = vmatpush3.bf16.msra.mxu1 %v5147_v47  ;;  %v2616_v47 = vsel %vm2602_vm3, %v2601_v44, 0.0  ;;  %v3423_v44 = vld [vmem:[%s6801_s10] ss:$0 sm:$0xff]  ;;  %s5288_s10 = smov 124  }
 0x319   :  { %5152 = vmatprep.subr.bf16.mxu1 %v5151_v52  ;;  %v2617_v50 = vadd.f32 %v2616_v47, %v2615_v46  ;;  %p5267_p3 = por %p5266_p2, %p5265_p1 }
 0x31b   :  { %p5268_p4 = pnand %p5267_p3, %p5261_p0 }
 0x31c   :  { %5154 = vmatpush3.bf16.msra.mxu1 %v5151_v52  ;;  %v2618_v52 = vrot.slane %v2617_v50, 4 }
 0x31d   :  { %5156 = vmatprep.subr.bf16.mxu1 %v5155_v55 }
 0x31e   :  { %v2619_v48 = vadd.f32 %v2618_v52, %v2617_v50 }
 0x31f   :  { %4563 = vmatmul.mubr.msk.f32.vlgmr.msra.gmra.mrb[14].mxu1 %vm347_vm2, %v2270_v63 }
 0x320   :  { %5158 = vmatpush3.bf16.msra.mxu1 %v5155_v55  ;;  %4581 = vmatprep.mubr.msk.f32.mxu1 %vm347_vm2, %v2366_v1  ;;  %v2620_v59 = vrot.slane %v2619_v48, 2 }
 0x321   :  { %5160 = vmatprep.subr.bf16.mxu1 %v5159_v0 }
 0x322   :  { %v2621_v63 = vadd.f32 %v2620_v59, %v2619_v48 }
 0x324   :  { %5162 = vmatpush3.bf16.msra.mxu1 %v5159_v0  ;;  %v2622_v0 = vrot.slane %v2621_v63, 1 }
 0x325   :  { %5164 = vmatprep.subr.bf16.mxu1 %v5163_v3 }
 0x326   :  { %v2623_v40 = vadd.f32 %v2622_v0, %v2621_v63 }
 0x328   :  { %5166 = vmatpush3.bf16.msra.mxu1 %v5163_v3  ;;  %v2624_v3 = vadd.f32 1e-10, %v2623_v40 }
 0x329   :  { %5168 = vmatprep.subr.bf16.mxu1 %v5167_v37 }
 0x32a   :  { %5242 = vrsqrt.f32 %v2624_v3 }
 0x32c   :  { %5170 = vmatpush3.bf16.msra.mxu1 %v5167_v37 }
 0x32f   :  { %4582 = vmatmul.mubr.msk.f32.vlgmr.msra.gmra.mrb[14].mxu1 %vm347_vm2, %v2370_v8 }
 0x334   :  { %v5243_v5 = vpop.eup %5242 }
 0x335   :  { %v2626_v37 = vmul.f32 %v5243_v5, %v2586_v16  ;;  %v2627_v61 = vmul.f32 %v5243_v5, %v2587_v17  ;;  %v2628_v8 = vmul.f32 %v5243_v5, %v2588_v41  ;;  %v2629_v57 = vmul.f32 %v5243_v5, %v2589_v23  ;;  %v2744_v23 = vld [vmem:[%s6800_s9 + $0x18] sm:$0xff] }
 0x336   :  { %v2630_v9 = vmul.f32 %v5243_v5, %v2590_v6  ;;  %v2631_v32 = vmul.f32 %v5243_v5, %v2591_v29  ;;  %v5207_v26 = vpack.c.bf16 %v2744_v23, %v2743_v21  ;;  %v2745_v6 = vld [vmem:[%s6800_s9 + $0x20] sm:$0xff]  ;;  %v2748_v29 = vld [vmem:[%s6800_s9 + $0x38] sm:$0xff] }
 0x337   :  { %v5187_v7 = vpack.c.bf16 %v2627_v61, %v2626_v37  ;;  %v5211_v27 = vpack.c.bf16 %v2746_v30, %v2745_v6  ;;  %v5215_v31 = vpack.c.bf16 %v2748_v29, %v2747_v28  ;;  %v3013_v37 = vlaneseq }
 0x339   :  { %5188 = vmatprep.subr.bf16.mxu0 %v5187_v7  ;;  %v3014_v61 = vand.u32 127, %v3013_v37 }
 0x33b   :  { %vm3015_vm6 = vcmp.lt.s32.totalorder %v3014_v61, 2 }
 0x402   :  { %v4583_v11 = vpop.f32.mrb[14].mxu1 }
 0x403   :  { %v2471_v12 = vadd.f32 %v4583_v11, %v3417_v10  ;;  %v2452_v14 = vpop.f32.mrb[15].mxu1  ;;  %v2632_v11 = vmul.f32 %v5243_v5, %v2592_v36  ;;  %v2838_v36 = vld [vmem:[%s6794_s3 + $0x8] sm:$0xff]  ;;  %s5287_s3 = smov 4  }
 0x404   :  { %v2470_v22 = vadd.f32 %v3417_v10, %v2452_v14  ;;  %v5191_v10 = vpack.c.bf16 %v2629_v57, %v2628_v8  ;;  %v5195_v14 = vpack.c.bf16 %v2631_v32, %v2630_v9  ;;  %v5289_v8 = vmov 0.5  }
 0x405   :  { %v2473_v15 = vmax.f32 %v2471_v12, 0.0  ;;  %v2633_v12 = vmul.f32 %v5243_v5, %v2593_v42  ;;  %v3016_v57 = vsel %vm3015_vm6, -0.5, %v5289_v8 }
 0x406   :  { %v2472_v49 = vmax.f32 %v2470_v22, 0.0 }
 0x407   :  { %v5199_v22 = vpack.c.bf16 %v2633_v12, %v2632_v11 }
 0x408   :  { %4600 = vmatprep.mubr.msk.f32.mxu0 %vm347_vm2, %v2472_v49  ;;  %v2741_v49 = vld [vmem:[%s6800_s9] sm:$0xff] }
 0x409   :  { %4601 = vmatmul.mubr.msk.f32.vlgmr.msra.gmra.mrb[34].mxu0 %vm347_vm2, %v2473_v15  ;;  %v2742_v15 = vld [vmem:[%s6800_s9 + $0x8] sm:$0xff] }
 0x40a   :  { %5190 = vmatpush3.bf16.msra.mxu0 %v5187_v7  ;;  %v5203_v16 = vpack.c.bf16 %v2742_v15, %v2741_v49 }
 0x40b   :  { %5192 = vmatprep.subr.bf16.mxu0 %v5191_v10 }
 0x40e   :  { %5194 = vmatpush3.bf16.msra.mxu0 %v5191_v10 }
 0x40f   :  { %5196 = vmatprep.subr.bf16.mxu0 %v5195_v14 }
 0x412   :  { %5198 = vmatpush3.bf16.msra.mxu0 %v5195_v14 }
 0x413   :  { %5200 = vmatprep.subr.bf16.mxu0 %v5199_v22 }
 0x416   :  { %5202 = vmatpush3.bf16.msra.mxu0 %v5199_v22 }
 0x417   :  { %5204 = vmatprep.subr.bf16.mxu0 %v5203_v16 }
 0x4dc   :  { %v4602_v53 = vpop.f32.mrb[34].mxu0 }
 0x4dd   :  { %v2567_v54 = vadd.f32 %v4602_v53, %v3418_v51  ;;  %v2561_v55 = vpop.f32.mrb[35].mxu0 }
 0x4de   :  { %v2562_v58 = vadd.f32 %v3418_v51, %v2561_v55 }
 0x4df   :  { %v6702_v60 = vmax.f32 %v2567_v54, 0.0 }
 0x4e0   :  { %v2570_v62 = vmax.f32 %v2562_v58, 0.0 }
 0x4e1   :  { %v2573_v2 = vmul.f32 %v6702_v60, %v6702_v60 }
 0x4e2   :  { %v2572_v43 = vmul.f32 %v2570_v62, %v2570_v62 }
 0x4e3   :  { %v2577_v4 = vsel %vm347_vm2, %v2573_v2, 0.0 }
 0x4e4   :  { %v2574_v1 = vsel %vm347_vm2, %v2572_v43, 0.0 }
 0x4e5   :  { %2575 = vadd.xlane.f32.xlu0 %v2574_v1 }
 0x4e9   :  { %2578 = vadd.xlane.f32.xlu0 %v2577_v4 }
 0x572   :  { %v2576_v17 = vpop.xlane.xlu0 %2575 }
 0x573   :  { %v2580_v18 = vadd.f32 1e-10, %v2576_v17 }
 0x575   :  { %5244 = vrsqrt.f32 %v2580_v18 }
 0x576   :  { %v2579_v13 = vpop.xlane.xlu0 %2578 }
 0x577   :  { %v2581_v41 = vadd.f32 1e-10, %v2579_v13 }
 0x579   :  { %5246 = vrsqrt.f32 %v2581_v41 }
 0x57f   :  { %v5245_v19 = vpop.eup %5244 }
 0x580   :  { %v2584_v20 = vmul.f32 %v5245_v19, %v2570_v62 }
 0x582   :  { %4619 = vmatprep.mubr.msk.f32.mxu0 %vm347_vm2, %v2584_v20 }
 0x583   :  { %v5247_v24 = vpop.eup %5246 }
 0x584   :  { %v2585_v25 = vmul.f32 %v5247_v24, %v6702_v60 }
 0x586   :  { %4620 = vmatmul.mubr.msk.f32.vlgmr.msra.gmra.mrb[36].mxu0 %vm347_vm2, %v2585_v25 }
 0x587   :  { %5206 = vmatpush3.bf16.msra.mxu0 %v5203_v16  ;;  %4638 = vmatprep.mubr.msk.f32.mxu0 %vm347_vm2, %v2570_v62 }
 0x588   :  { %5208 = vmatprep.subr.bf16.mxu0 %v5207_v26 }
 0x58b   :  { %5210 = vmatpush3.bf16.msra.mxu0 %v5207_v26 }
 0x58c   :  { %5212 = vmatprep.subr.bf16.mxu0 %v5211_v27 }
 0x58f   :  { %5214 = vmatpush3.bf16.msra.mxu0 %v5211_v27 }
 0x590   :  { %5216 = vmatprep.subr.bf16.mxu0 %v5215_v31 }
 0x593   :  { %5218 = vmatpush3.bf16.msra.mxu0 %v5215_v31 }
 0x594   :  { %4641 = vmatprep.subr.msk.mxu0 %vm2847_vm4, %v2839_v33 }
 0x596   :  { %4639 = vmatmul.mubr.msk.f32.vlgmr.msra.gmra.mrb[38].mxu0 %vm347_vm2, %v6702_v60 }
 0x597   :  { %4643 = vmatprep.mubr.msk.f32.mxu0 %vm2840_vm5, %v2837_v34  ;;  %4642 = vmatpush3.msk.msra.mxu0 %vm2847_vm4, %v2839_v33 }
 0x598   :  { %4646 = vmatprep.subr.msk.mxu0 %vm2847_vm4, %v2926_v56 }
 0x59a   :  { %4644 = vmatmul.mubr.msk.f32.vlgmr.msra.gmra.mrb[40].mxu0 %vm2840_vm5, %v2838_v36 }
 0x59b   :  { %4647 = vmatpush3.msk.msra.mxu0 %vm2847_vm4, %v2926_v56 }
 0x659   :  { %v4621_v38 = vpop.f32.mrb[36].mxu0 }
 0x65a   :  { %v2706_v39 = vpop.f32.mrb[37].mxu0  ;;  %v2716_v40 = vmul.f32 20.0, %v4621_v38 }
 0x65b   :  { %v2715_v42 = vmul.f32 20.0, %v2706_v39 }
 0x65c   :  { %v2720_v3 = vsel %vm2602_vm3, %v2716_v40, -inf }
 0x65d   :  { %v2717_v35 = vsel %vm2602_vm3, %v2715_v42, -inf }
 0x65e   :  { %2718 = vmax.xlane.f32.xlu0 %v2717_v35 }
 0x669   :  { %v4640_v45 = vpop.f32.mrb[38].mxu0 }
 0x66a   :  { %v2828_v46 = vpop.f32.mrb[39].mxu0  ;;  %v2834_v50 = vadd.f32 %v4640_v45, %v3423_v44 }
 0x66b   :  { %v2829_v47 = vadd.f32 %v3423_v44, %v2828_v46 }
 0x66d   :  { %4648 = vmatprep.mubr.msk.f32.mxu0 %vm2840_vm5, %v2829_v47  ;;  %v4645_v51 = vpop.f32.mrb[40].mxu0 }
 0x66e   :  { %4649 = vmatmul.mubr.msk.f32.vlgmr.msra.gmra.mrb[42].mxu0 %vm2840_vm5, %v2834_v50  ;;  %v2917_v52 = vpop.f32.mrb[41].mxu0 }
 0x6eb   :  { %v2719_v0 = vpop.xlane.xlu0 %2718 }
 0x6ec   :  { %v2723_v1 = vsub.f32 %v2715_v42, %v2719_v0 }
 0x6ee   :  { %v2725_v2 = vmul.f32 1.442695, %v2723_v1 }
 0x741   :  { %v4650_v53 = vpop.f32.mrb[42].mxu0 }
 0x742   :  { %v3012_v54 = vmin.f32 %v4650_v53, 4.1351666  ;;  %v3018_v55 = vmul.f32 %v4650_v53, %v4645_v51  ;;  %v3002_v48 = vpop.f32.mrb[43].mxu0 }
 0x743   :  { %v3011_v58 = vmin.f32 %v3002_v48, 4.1351666  ;;  %v3017_v59 = vmul.f32 %v3002_v48, %v2917_v52 }
 0x744   :  { %v3031_v60 = vmul.f32 1.442695, %v3012_v54 }
 0x745   :  { %3021 = vrot.lane.b32.xlu0 %v3017_v59, %s5287_s3  ;;  %v3029_v62 = vmul.f32 1.442695, %v3011_v58 }
 0x746   :  { %5248 = vpow2.f32 %v3031_v60 }
 0x747   :  { %5250 = vpow2.f32 %v3029_v62 }
 0x748   :  { %5252 = vpow2.f32 %v2725_v2 }
 0x749   :  { %3023 = vrot.lane.b32.xlu0 %v3018_v55, %s5287_s3 }
 0x750   :  { %v5249_v63 = vpop.eup %5248 }
 0x751   :  { %3037 = vrot.lane.b32.xlu1 %v5249_v63, %s5288_s10  ;;  %v5251_v43 = vpop.eup %5250 }
 0x752   :  { %v5253_v4 = vpop.eup %5252 }
 0x753   :  { %v2729_v5 = vsel %vm2602_vm3, %v5253_v4, 0.0 }
 0x755   :  { %3035 = vrot.lane.b32.xlu1 %v5251_v43, %s5288_s10 }
 0x779   :  { %2721 = vmax.xlane.f32.xlu1 %v2720_v3 }
 0x77d   :  { %2730 = vadd.xlane.f32.xlu1 %v2729_v5 }
 0x7b7   :  { %v3022_v41 = vpop.permute.xlu0 %3021 }
 0x7b8   :  { %v3027_v20 = vadd.f32 %v3022_v41, %v2917_v52 }
 0x7bb   :  { %v3024_v19 = vpop.permute.xlu0 %3023 }
 0x7bc   :  { %v3028_v24 = vadd.f32 %v4645_v51, %v3024_v19 }
 0x7c3   :  { %v3038_v7 = vpop.permute.xlu1 %3037 }
 0x7c4   :  { %v3042_v10 = vmul.f32 %v3038_v7, %v3016_v57 }
 0x7c6   :  { %v3044_v12 = vmul.f32 %v4645_v51, %v3042_v10 }
 0x7c7   :  { %v3036_v9 = vpop.permute.xlu1 %3035 }
 0x7c8   :  { %v3041_v32 = vmul.f32 %v3036_v9, %v3016_v57 }
 0x7ca   :  { %v3043_v11 = vmul.f32 %v3041_v32, %v2917_v52 }
 0x7cc   :  { %3047 = vrot.lane.b32.xlu0 %v3043_v11, %s5287_s3 }
 0x7d0   :  { %3049 = vrot.lane.b32.xlu0 %v3044_v12, %s5287_s3 }
 0x806   :  { %v2722_v14 = vpop.xlane.xlu1 %2721 }
 0x807   :  { %v2724_v22 = vsub.f32 %v2716_v40, %v2722_v14 }
 0x809   :  { %v2727_v49 = vmul.f32 1.442695, %v2724_v22 }
 0x80a   :  { %v2731_v15 = vpop.xlane.xlu1 %2730 }
 0x80b   :  { %5254 = vpow2.f32 %v2727_v49 }
 0x80c   :  { %5256 = vrcp.f32 %v2731_v15 }
 0x815   :  { %v5255_v16 = vpop.eup %5254 }
 0x816   :  { %v5257_v17 = vpop.eup %5256  ;;  %v2732_v18 = vsel %vm2602_vm3, %v5255_v16, 0.0 }
 0x817   :  { %2733 = vadd.xlane.f32.xlu0 %v2732_v18  ;;  %v2736_v13 = vmul.f32 %v5257_v17, %v5253_v4 }
 0x819   :  { %2739 = vst.msk [vmem:[#allocation3] sm:$0xff] %vm2602_vm3, %v2736_v13 }
 0x83e   :  { %v3048_v21 = vpop.permute.xlu0 %3047 }
 0x83f   :  { %v3053_v23 = vadd.f32 %v3048_v21, %v3027_v20 }
 0x841   :  { %v3055_v25 = vmax.f32 %v3053_v23, 0.0 }
 0x842   :  { %v3050_v26 = vpop.permute.xlu0 %3049 }
 0x843   :  { %v3057_v6 = vmin.f32 %v3055_v25, 64.0  ;;  %v3054_v30 = vadd.f32 %v3050_v26, %v3028_v24 }
 0x845   :  { %v3056_v27 = vmax.f32 %v3054_v30, 0.0  ;;  %3061 = vrot.lane.b32.xlu1 %v3057_v6, %s5288_s10 }
 0x847   :  { %v3058_v28 = vmin.f32 %v3056_v27, 64.0 }
 0x849   :  { %3063 = vrot.lane.b32.xlu1 %v3058_v28, %s5288_s10 }
 0x8a4   :  { %v2734_v29 = vpop.xlane.xlu0 %2733 }
 0x8a5   :  { %5258 = vrcp.f32 %v2734_v29 }
 0x8af   :  { %v5259_v31 = vpop.eup %5258 }
 0x8b0   :  { %v2738_v33 = vmul.f32 %v5259_v31, %v5255_v16 }
 0x8b2   :  { %2740 = vst.msk [vmem:[#allocation3 + $0x8] sm:$0xff] %vm2602_vm3, %v2738_v33 }
 0x8b3   :  { %5271 = shalt.err (!%p5268_p4)
}
 0x8b4   :  { %s5272_s4 = scalar_lea.hbm %s6804_s13, 256 }
 0x8b5   :  { %p5273_p5 = scmp.ne.s32.totalorder %s6804_s13, %s5272_s4  ;;  %p5276_p6 = scmp.lt.u32.totalorder %s5272_s4, %s6804_s13 }
 0x8b7   :  { %p5278_p7 = pnand %p5276_p6, %p5273_p5 }
 0x8b9   :  { %5281 = shalt.err (!%p5278_p7)
}
 0x8ba   :  { %s5291_s24 = smov 128   ;;  %s5292_s5 = smov 8   ;;  %v3062_v34 = vpop.permute.xlu1 %3061 }
 0x8bb   :  { %3080 = dma.vmem_to_hbm [thread:$0]  %s3075_s7, 256, %s6804_s13, [#allocation4], %s5291_s24, %s5291_s24, %s5292_s5  }
 0x8bc   :  { %3067 = vst.msk [vmem:[%s6805_s14] sm:$0xff] %vm2840_vm5, %v3062_v34 }
 0x8be   :  { %v3064_v36 = vpop.permute.xlu1 %3063 }
 0x8bf   :  { %3068 = vst.msk [vmem:[%s6805_s14 + $0x8] sm:$0xff] %vm2840_vm5, %v3064_v36 }
 0x8c0   :  { %5282 = dma.done.wait [#allocation4], 256  }
 0x8c1   :  { %5283 = vsyncadd [#allocation4], 4294967040 }
 0x8c2   :  { %3088 = vsyncpa [#allocation4], 1 }

</bundles_post_ra>
